<compile_context>
chip_gen: v7x
topology: tpu7x:2x2x1
jax: 0.10.0
libtpu: 0.0.40
codegen_flags: <defaults>
</compile_context>

<pallas_src>
import jax
import jax.numpy as jnp
from jax import lax
from jax.experimental import pallas as pl
from jax.experimental.pallas import tpu as pltpu

# Small, forward-consistent shapes.
INPUT_SIZE = 1            # forced by input_batch.unsqueeze(dim=2)
HIDDEN = 32
NUM_LAYERS = 2            # fused kernel below assumes exactly 2 layers
SEQ = 8
BATCH = 2
FC_IN = SEQ * HIDDEN      # 256 = fc_in_features
LN_EPS = 1e-5


def _layernorm(x, gamma, beta):
    mu = jnp.mean(x, axis=-1, keepdims=True)
    var = jnp.mean((x - mu) ** 2, axis=-1, keepdims=True)
    return (x - mu) * lax.rsqrt(var + LN_EPS) * gamma + beta


# --------------------------- Fused model kernel -------------------------------
def fused_model_kernel(x_ref, h0_ref,
                       wih0_ref, whh0_ref, b0_ref,
                       wih1_ref, whh1_ref, b1_ref,
                       w1_ref, bc1_ref, g1_ref, be1_ref,
                       w2_ref, bc2_ref, g2_ref, be2_ref,
                       o_ref, feat_scr):
    """Full forward pass.  x: (B,T), h0: (2,B,H) -> logits (B,4)."""
    # ---------------- RNN: 2 layers, tanh, unrolled & interleaved ------------
    x = x_ref[...]                                               # (B, T)
    # Layer-0 input projection is independent of the recurrence -> hoist.
    # input_size == 1 so W_ih^T is (1, H): (B,T,1)*(1,1,H) broadcast.
    xp0_all = (x[:, :, None] * wih0_ref[...][None, :, :]
               + b0_ref[...][None, :, :])                        # (B, T, H)

    h1 = h0_ref[0]                                               # (B, H) layer-1 state
    h2 = h0_ref[1]                                               # (B, H) layer-2 state
    for t in range(SEQ):                                         # static unroll, T=8
        # layer 1: h1 = tanh(x_t Wih0^T + b0 + h1 Whh0^T)
        h1 = jnp.tanh(
            xp0_all[:, t, :]
            + jnp.dot(h1, whh0_ref[...], preferred_element_type=jnp.float32))
        # layer 2: h2 = tanh(h1 Wih1^T + b1 + h2 Whh1^T)
        h2 = jnp.tanh(
            jnp.dot(h1, wih1_ref[...], preferred_element_type=jnp.float32)
            + b1_ref[...]
            + jnp.dot(h2, whh1_ref[...], preferred_element_type=jnp.float32))
        # Write directly in flattened (B, T*H) feature layout (static slice).
        feat_scr[:, t * HIDDEN:(t + 1) * HIDDEN] = h2

    # ---------------------------- Classifier ---------------------------------
    feats = feat_scr[...]                                        # (B, 256)
    # Linear(256 -> 512)
    h = jnp.dot(feats, w1_ref[...],
                preferred_element_type=jnp.float32) + bc1_ref[...]
    # LayerNorm(512) + ReLU
    h = _layernorm(h, g1_ref[...], be1_ref[...])
    h = jnp.maximum(h, 0.0)
    # TODO(synk): Dropout(p=0.5) is identity in eval mode; training-mode random mask omitted.
    # Linear(512 -> 4)
    z = jnp.dot(h, w2_ref[...],
                preferred_element_type=jnp.float32) + bc2_ref[...]
    # LayerNorm(4)
    o_ref[...] = _layernorm(z, g2_ref[...], be2_ref[...])


# ------------------------------ Parameter init --------------------------------
def init_params(key):
    params = {"rnn": [], "cls": {}}
    rnn_scale = 1.0 / jnp.sqrt(jnp.float32(HIDDEN))
    keys = jax.random.split(key, 4 * NUM_LAYERS + 4)
    ki = 0
    for layer in range(NUM_LAYERS):
        in_dim = INPUT_SIZE if layer == 0 else HIDDEN
        w_ih = jax.random.uniform(keys[ki], (HIDDEN, in_dim), jnp.float32,
                                  -rnn_scale, rnn_scale); ki += 1
        w_hh = jax.random.uniform(keys[ki], (HIDDEN, HIDDEN), jnp.float32,
                                  -rnn_scale, rnn_scale); ki += 1
        b_ih = jax.random.uniform(keys[ki], (HIDDEN,), jnp.float32,
                                  -rnn_scale, rnn_scale); ki += 1
        b_hh = jax.random.uniform(keys[ki], (HIDDEN,), jnp.float32,
                                  -rnn_scale, rnn_scale); ki += 1
        params["rnn"].append({
            "wih_t": jnp.transpose(w_ih),                 # (in_dim, H)
            "whh_t": jnp.transpose(w_hh),                 # (H, H)
            "b": (b_ih + b_hh).reshape(1, HIDDEN),        # (1, H), b_ih + b_hh folded
        })

    s1 = 1.0 / jnp.sqrt(jnp.float32(FC_IN))
    s2 = 1.0 / jnp.sqrt(jnp.float32(512))
    params["cls"] = {
        "w1": jax.random.uniform(keys[ki + 0], (FC_IN, 512), jnp.float32, -s1, s1),
        "b1": jax.random.uniform(keys[ki + 1], (1, 512), jnp.float32, -s1, s1),
        "g1": jnp.ones((1, 512), jnp.float32),            # LayerNorm default weight
        "be1": jnp.zeros((1, 512), jnp.float32),          # LayerNorm default bias
        "w2": jax.random.uniform(keys[ki + 2], (512, 4), jnp.float32, -s2, s2),
        "b2": jax.random.uniform(keys[ki + 3], (1, 4), jnp.float32, -s2, s2),
        "g2": jnp.ones((1, 4), jnp.float32),
        "be2": jnp.zeros((1, 4), jnp.float32),
    }
    return params


# --------------------------------- Forward ------------------------------------
def rnn_model_forward(h0, input_batch, params):
    """h0: (num_layers, B, H), input_batch: (B, T).  Returns logits (B, 4)."""
    B, T = input_batch.shape
    r0, r1 = params["rnn"]
    c = params["cls"]
    vmem = pl.BlockSpec(memory_space=pltpu.MemorySpace.VMEM)
    return pl.pallas_call(
        fused_model_kernel,
        out_shape=jax.ShapeDtypeStruct((B, 4), jnp.float32),
        in_specs=[vmem] * 16,
        out_specs=vmem,
        scratch_shapes=[pltpu.VMEM((B, T * HIDDEN), jnp.float32)],
    )(input_batch.astype(jnp.float32), h0,
      r0["wih_t"], r0["whh_t"], r0["b"],
      r1["wih_t"], r1["whh_t"], r1["b"],
      c["w1"], c["b1"], c["g1"], c["be1"],
      c["w2"], c["b2"], c["g2"], c["be2"])


if __name__ == "__main__":
    key = jax.random.PRNGKey(0)
    k_param, k_x, k_h = jax.random.split(key, 3)

    params = init_params(k_param)
    input_batch = jax.random.normal(k_x, (BATCH, SEQ), jnp.float32)
    h0 = jax.random.normal(k_h, (NUM_LAYERS, BATCH, HIDDEN), jnp.float32)

    logits = jax.jit(lambda h, x: rnn_model_forward(h, x, params))(h0, input_batch)
    jax.block_until_ready(logits)
    assert logits.shape == (BATCH, 4), logits.shape
    print("KERNEL_OK")
</pallas_src>

<mosaic_0001>
module attributes {stable_mosaic.version = 11 : i64} {
  func.func @fused_model_kernel(%arg0: memref<2x8xf32, #tpu.memory_space<vmem>>, %arg1: memref<2x2x32xf32, #tpu.memory_space<vmem>>, %arg2: memref<1x32xf32, #tpu.memory_space<vmem>>, %arg3: memref<32x32xf32, #tpu.memory_space<vmem>>, %arg4: memref<1x32xf32, #tpu.memory_space<vmem>>, %arg5: memref<32x32xf32, #tpu.memory_space<vmem>>, %arg6: memref<32x32xf32, #tpu.memory_space<vmem>>, %arg7: memref<1x32xf32, #tpu.memory_space<vmem>>, %arg8: memref<256x512xf32, #tpu.memory_space<vmem>>, %arg9: memref<1x512xf32, #tpu.memory_space<vmem>>, %arg10: memref<1x512xf32, #tpu.memory_space<vmem>>, %arg11: memref<1x512xf32, #tpu.memory_space<vmem>>, %arg12: memref<512x4xf32, #tpu.memory_space<vmem>>, %arg13: memref<1x4xf32, #tpu.memory_space<vmem>>, %arg14: memref<1x4xf32, #tpu.memory_space<vmem>>, %arg15: memref<1x4xf32, #tpu.memory_space<vmem>>, %arg16: memref<2x4xf32, #tpu.memory_space<vmem>>, %arg17: memref<2x256xf32, #tpu.memory_space<vmem>>) attributes {dimension_semantics = [], scalar_prefetch = 0 : i64, scratch_operands = 1 : i64, tpu.core_type = #tpu.core_type<tc>} {
    %c0 = arith.constant 0 : index
    %c0_0 = arith.constant 0 : index
    %0 = vector.load %arg0[%c0, %c0_0] : memref<2x8xf32, #tpu.memory_space<vmem>>, vector<2x8xf32>
    %1 = vector.shape_cast %0 : vector<2x8xf32> to vector<2x8x1xf32>
    %c0_1 = arith.constant 0 : index
    %c0_2 = arith.constant 0 : index
    %2 = vector.load %arg2[%c0_1, %c0_2] : memref<1x32xf32, #tpu.memory_space<vmem>>, vector<1x32xf32>
    %3 = vector.shape_cast %2 : vector<1x32xf32> to vector<1x1x32xf32>
    %4 = vector.broadcast %1 : vector<2x8x1xf32> to vector<2x8x32xf32>
    %5 = vector.broadcast %3 : vector<1x1x32xf32> to vector<2x8x32xf32>
    %6 = arith.mulf %4, %5 : vector<2x8x32xf32>
    %c0_3 = arith.constant 0 : index
    %c0_4 = arith.constant 0 : index
    %7 = vector.load %arg4[%c0_3, %c0_4] : memref<1x32xf32, #tpu.memory_space<vmem>>, vector<1x32xf32>
    %8 = vector.shape_cast %7 : vector<1x32xf32> to vector<1x1x32xf32>
    %9 = vector.broadcast %8 : vector<1x1x32xf32> to vector<2x8x32xf32>
    %10 = arith.addf %6, %9 : vector<2x8x32xf32>
    %c0_5 = arith.constant 0 : index
    %c0_6 = arith.constant 0 : index
    %c0_7 = arith.constant 0 : index
    %11 = vector.load %arg1[%c0_5, %c0_6, %c0_7] : memref<2x2x32xf32, #tpu.memory_space<vmem>>, vector<1x2x32xf32>
    %12 = vector.shape_cast %11 : vector<1x2x32xf32> to vector<2x32xf32>
    %c1 = arith.constant 1 : index
    %c0_8 = arith.constant 0 : index
    %c0_9 = arith.constant 0 : index
    %13 = vector.load %arg1[%c1, %c0_8, %c0_9] : memref<2x2x32xf32, #tpu.memory_space<vmem>>, vector<1x2x32xf32>
    %14 = vector.shape_cast %13 : vector<1x2x32xf32> to vector<2x32xf32>
    %15 = vector.extract_strided_slice %10 {offsets = [0, 0, 0], sizes = [2, 1, 32], strides = [1, 1, 1]} : vector<2x8x32xf32> to vector<2x1x32xf32>
    %16 = vector.shape_cast %15 : vector<2x1x32xf32> to vector<2x32xf32>
    %c0_10 = arith.constant 0 : index
    %c0_11 = arith.constant 0 : index
    %17 = vector.load %arg3[%c0_10, %c0_11] : memref<32x32xf32, #tpu.memory_space<vmem>>, vector<32x32xf32>
    %cst = arith.constant dense<0.000000e+00> : vector<2x32xf32>
    %18 = tpu.matmul %12, %17, %cst {dimension_numbers = #tpu.dot_dimension_numbers<[1], [0], [0], [1], [0, 0, 1, 1], [], []>} : vector<2x32xf32>, vector<32x32xf32>, vector<2x32xf32> -> vector<2x32xf32>
    %19 = arith.addf %16, %18 : vector<2x32xf32>
    %20 = math.tanh %19 : vector<2x32xf32>
    %c0_12 = arith.constant 0 : index
    %c0_13 = arith.constant 0 : index
    %21 = vector.load %arg5[%c0_12, %c0_13] : memref<32x32xf32, #tpu.memory_space<vmem>>, vector<32x32xf32>
    %cst_14 = arith.constant dense<0.000000e+00> : vector<2x32xf32>
    %22 = tpu.matmul %20, %21, %cst_14 {dimension_numbers = #tpu.dot_dimension_numbers<[1], [0], [0], [1], [0, 0, 1, 1], [], []>} : vector<2x32xf32>, vector<32x32xf32>, vector<2x32xf32> -> vector<2x32xf32>
    %c0_15 = arith.constant 0 : index
    %c0_16 = arith.constant 0 : index
    %23 = vector.load %arg7[%c0_15, %c0_16] : memref<1x32xf32, #tpu.memory_space<vmem>>, vector<1x32xf32>
    %24 = vector.broadcast %23 : vector<1x32xf32> to vector<2x32xf32>
    %25 = arith.addf %22, %24 : vector<2x32xf32>
    %c0_17 = arith.constant 0 : index
    %c0_18 = arith.constant 0 : index
    %26 = vector.load %arg6[%c0_17, %c0_18] : memref<32x32xf32, #tpu.memory_space<vmem>>, vector<32x32xf32>
    %cst_19 = arith.constant dense<0.000000e+00> : vector<2x32xf32>
    %27 = tpu.matmul %14, %26, %cst_19 {dimension_numbers = #tpu.dot_dimension_numbers<[1], [0], [0], [1], [0, 0, 1, 1], [], []>} : vector<2x32xf32>, vector<32x32xf32>, vector<2x32xf32> -> vector<2x32xf32>
    %28 = arith.addf %25, %27 : vector<2x32xf32>
    %29 = math.tanh %28 : vector<2x32xf32>
    %c0_20 = arith.constant 0 : index
    %c0_21 = arith.constant 0 : index
    %30 = vector.load %arg17[%c0_20, %c0_21] : memref<2x256xf32, #tpu.memory_space<vmem>>, vector<2x32xf32>
    tpu.vector_store %arg17[%c0_20, %c0_21], %29 {strides = array<i32>} : memref<2x256xf32, #tpu.memory_space<vmem>>, vector<2x32xf32>,
    %31 = vector.extract_strided_slice %10 {offsets = [0, 1, 0], sizes = [2, 1, 32], strides = [1, 1, 1]} : vector<2x8x32xf32> to vector<2x1x32xf32>
    %32 = vector.shape_cast %31 : vector<2x1x32xf32> to vector<2x32xf32>
    %c0_22 = arith.constant 0 : index
    %c0_23 = arith.constant 0 : index
    %33 = vector.load %arg3[%c0_22, %c0_23] : memref<32x32xf32, #tpu.memory_space<vmem>>, vector<32x32xf32>
    %cst_24 = arith.constant dense<0.000000e+00> : vector<2x32xf32>
    %34 = tpu.matmul %20, %33, %cst_24 {dimension_numbers = #tpu.dot_dimension_numbers<[1], [0], [0], [1], [0, 0, 1, 1], [], []>} : vector<2x32xf32>, vector<32x32xf32>, vector<2x32xf32> -> vector<2x32xf32>
    %35 = arith.addf %32, %34 : vector<2x32xf32>
    %36 = math.tanh %35 : vector<2x32xf32>
    %c0_25 = arith.constant 0 : index
    %c0_26 = arith.constant 0 : index
    %37 = vector.load %arg5[%c0_25, %c0_26] : memref<32x32xf32, #tpu.memory_space<vmem>>, vector<32x32xf32>
    %cst_27 = arith.constant dense<0.000000e+00> : vector<2x32xf32>
    %38 = tpu.matmul %36, %37, %cst_27 {dimension_numbers = #tpu.dot_dimension_numbers<[1], [0], [0], [1], [0, 0, 1, 1], [], []>} : vector<2x32xf32>, vector<32x32xf32>, vector<2x32xf32> -> vector<2x32xf32>
    %c0_28 = arith.constant 0 : index
    %c0_29 = arith.constant 0 : index
    %39 = vector.load %arg7[%c0_28, %c0_29] : memref<1x32xf32, #tpu.memory_space<vmem>>, vector<1x32xf32>
    %40 = vector.broadcast %39 : vector<1x32xf32> to vector<2x32xf32>
    %41 = arith.addf %38, %40 : vector<2x32xf32>
    %c0_30 = arith.constant 0 : index
    %c0_31 = arith.constant 0 : index
    %42 = vector.load %arg6[%c0_30, %c0_31] : memref<32x32xf32, #tpu.memory_space<vmem>>, vector<32x32xf32>
    %cst_32 = arith.constant dense<0.000000e+00> : vector<2x32xf32>
    %43 = tpu.matmul %29, %42, %cst_32 {dimension_numbers = #tpu.dot_dimension_numbers<[1], [0], [0], [1], [0, 0, 1, 1], [], []>} : vector<2x32xf32>, vector<32x32xf32>, vector<2x32xf32> -> vector<2x32xf32>
    %44 = arith.addf %41, %43 : vector<2x32xf32>
    %45 = math.tanh %44 : vector<2x32xf32>
    %c0_33 = arith.constant 0 : index
    %c32 = arith.constant 32 : index
    %46 = vector.load %arg17[%c0_33, %c32] : memref<2x256xf32, #tpu.memory_space<vmem>>, vector<2x32xf32>
    tpu.vector_store %arg17[%c0_33, %c32], %45 {strides = array<i32>} : memref<2x256xf32, #tpu.memory_space<vmem>>, vector<2x32xf32>,
    %47 = vector.extract_strided_slice %10 {offsets = [0, 2, 0], sizes = [2, 1, 32], strides = [1, 1, 1]} : vector<2x8x32xf32> to vector<2x1x32xf32>
    %48 = vector.shape_cast %47 : vector<2x1x32xf32> to vector<2x32xf32>
    %c0_34 = arith.constant 0 : index
    %c0_35 = arith.constant 0 : index
    %49 = vector.load %arg3[%c0_34, %c0_35] : memref<32x32xf32, #tpu.memory_space<vmem>>, vector<32x32xf32>
    %cst_36 = arith.constant dense<0.000000e+00> : vector<2x32xf32>
    %50 = tpu.matmul %36, %49, %cst_36 {dimension_numbers = #tpu.dot_dimension_numbers<[1], [0], [0], [1], [0, 0, 1, 1], [], []>} : vector<2x32xf32>, vector<32x32xf32>, vector<2x32xf32> -> vector<2x32xf32>
    %51 = arith.addf %48, %50 : vector<2x32xf32>
    %52 = math.tanh %51 : vector<2x32xf32>
    %c0_37 = arith.constant 0 : index
    %c0_38 = arith.constant 0 : index
    %53 = vector.load %arg5[%c0_37, %c0_38] : memref<32x32xf32, #tpu.memory_space<vmem>>, vector<32x32xf32>
    %cst_39 = arith.constant dense<0.000000e+00> : vector<2x32xf32>
    %54 = tpu.matmul %52, %53, %cst_39 {dimension_numbers = #tpu.dot_dimension_numbers<[1], [0], [0], [1], [0, 0, 1, 1], [], []>} : vector<2x32xf32>, vector<32x32xf32>, vector<2x32xf32> -> vector<2x32xf32>
    %c0_40 = arith.constant 0 : index
    %c0_41 = arith.constant 0 : index
    %55 = vector.load %arg7[%c0_40, %c0_41] : memref<1x32xf32, #tpu.memory_space<vmem>>, vector<1x32xf32>
    %56 = vector.broadcast %55 : vector<1x32xf32> to vector<2x32xf32>
    %57 = arith.addf %54, %56 : vector<2x32xf32>
    %c0_42 = arith.constant 0 : index
    %c0_43 = arith.constant 0 : index
    %58 = vector.load %arg6[%c0_42, %c0_43] : memref<32x32xf32, #tpu.memory_space<vmem>>, vector<32x32xf32>
    %cst_44 = arith.constant dense<0.000000e+00> : vector<2x32xf32>
    %59 = tpu.matmul %45, %58, %cst_44 {dimension_numbers = #tpu.dot_dimension_numbers<[1], [0], [0], [1], [0, 0, 1, 1], [], []>} : vector<2x32xf32>, vector<32x32xf32>, vector<2x32xf32> -> vector<2x32xf32>
    %60 = arith.addf %57, %59 : vector<2x32xf32>
    %61 = math.tanh %60 : vector<2x32xf32>
    %c0_45 = arith.constant 0 : index
    %c64 = arith.constant 64 : index
    %62 = vector.load %arg17[%c0_45, %c64] : memref<2x256xf32, #tpu.memory_space<vmem>>, vector<2x32xf32>
    tpu.vector_store %arg17[%c0_45, %c64], %61 {strides = array<i32>} : memref<2x256xf32, #tpu.memory_space<vmem>>, vector<2x32xf32>,
    %63 = vector.extract_strided_slice %10 {offsets = [0, 3, 0], sizes = [2, 1, 32], strides = [1, 1, 1]} : vector<2x8x32xf32> to vector<2x1x32xf32>
    %64 = vector.shape_cast %63 : vector<2x1x32xf32> to vector<2x32xf32>
    %c0_46 = arith.constant 0 : index
    %c0_47 = arith.constant 0 : index
    %65 = vector.load %arg3[%c0_46, %c0_47] : memref<32x32xf32, #tpu.memory_space<vmem>>, vector<32x32xf32>
    %cst_48 = arith.constant dense<0.000000e+00> : vector<2x32xf32>
    %66 = tpu.matmul %52, %65, %cst_48 {dimension_numbers = #tpu.dot_dimension_numbers<[1], [0], [0], [1], [0, 0, 1, 1], [], []>} : vector<2x32xf32>, vector<32x32xf32>, vector<2x32xf32> -> vector<2x32xf32>
    %67 = arith.addf %64, %66 : vector<2x32xf32>
    %68 = math.tanh %67 : vector<2x32xf32>
    %c0_49 = arith.constant 0 : index
    %c0_50 = arith.constant 0 : index
    %69 = vector.load %arg5[%c0_49, %c0_50] : memref<32x32xf32, #tpu.memory_space<vmem>>, vector<32x32xf32>
    %cst_51 = arith.constant dense<0.000000e+00> : vector<2x32xf32>
    %70 = tpu.matmul %68, %69, %cst_51 {dimension_numbers = #tpu.dot_dimension_numbers<[1], [0], [0], [1], [0, 0, 1, 1], [], []>} : vector<2x32xf32>, vector<32x32xf32>, vector<2x32xf32> -> vector<2x32xf32>
    %c0_52 = arith.constant 0 : index
    %c0_53 = arith.constant 0 : index
    %71 = vector.load %arg7[%c0_52, %c0_53] : memref<1x32xf32, #tpu.memory_space<vmem>>, vector<1x32xf32>
    %72 = vector.broadcast %71 : vector<1x32xf32> to vector<2x32xf32>
    %73 = arith.addf %70, %72 : vector<2x32xf32>
    %c0_54 = arith.constant 0 : index
    %c0_55 = arith.constant 0 : index
    %74 = vector.load %arg6[%c0_54, %c0_55] : memref<32x32xf32, #tpu.memory_space<vmem>>, vector<32x32xf32>
    %cst_56 = arith.constant dense<0.000000e+00> : vector<2x32xf32>
    %75 = tpu.matmul %61, %74, %cst_56 {dimension_numbers = #tpu.dot_dimension_numbers<[1], [0], [0], [1], [0, 0, 1, 1], [], []>} : vector<2x32xf32>, vector<32x32xf32>, vector<2x32xf32> -> vector<2x32xf32>
    %76 = arith.addf %73, %75 : vector<2x32xf32>
    %77 = math.tanh %76 : vector<2x32xf32>
    %c0_57 = arith.constant 0 : index
    %c96 = arith.constant 96 : index
    %78 = vector.load %arg17[%c0_57, %c96] : memref<2x256xf32, #tpu.memory_space<vmem>>, vector<2x32xf32>
    tpu.vector_store %arg17[%c0_57, %c96], %77 {strides = array<i32>} : memref<2x256xf32, #tpu.memory_space<vmem>>, vector<2x32xf32>,
    %79 = vector.extract_strided_slice %10 {offsets = [0, 4, 0], sizes = [2, 1, 32], strides = [1, 1, 1]} : vector<2x8x32xf32> to vector<2x1x32xf32>
    %80 = vector.shape_cast %79 : vector<2x1x32xf32> to vector<2x32xf32>
    %c0_58 = arith.constant 0 : index
    %c0_59 = arith.constant 0 : index
    %81 = vector.load %arg3[%c0_58, %c0_59] : memref<32x32xf32, #tpu.memory_space<vmem>>, vector<32x32xf32>
    %cst_60 = arith.constant dense<0.000000e+00> : vector<2x32xf32>
    %82 = tpu.matmul %68, %81, %cst_60 {dimension_numbers = #tpu.dot_dimension_numbers<[1], [0], [0], [1], [0, 0, 1, 1], [], []>} : vector<2x32xf32>, vector<32x32xf32>, vector<2x32xf32> -> vector<2x32xf32>
    %83 = arith.addf %80, %82 : vector<2x32xf32>
    %84 = math.tanh %83 : vector<2x32xf32>
    %c0_61 = arith.constant 0 : index
    %c0_62 = arith.constant 0 : index
    %85 = vector.load %arg5[%c0_61, %c0_62] : memref<32x32xf32, #tpu.memory_space<vmem>>, vector<32x32xf32>
    %cst_63 = arith.constant dense<0.000000e+00> : vector<2x32xf32>
    %86 = tpu.matmul %84, %85, %cst_63 {dimension_numbers = #tpu.dot_dimension_numbers<[1], [0], [0], [1], [0, 0, 1, 1], [], []>} : vector<2x32xf32>, vector<32x32xf32>, vector<2x32xf32> -> vector<2x32xf32>
    %c0_64 = arith.constant 0 : index
    %c0_65 = arith.constant 0 : index
    %87 = vector.load %arg7[%c0_64, %c0_65] : memref<1x32xf32, #tpu.memory_space<vmem>>, vector<1x32xf32>
    %88 = vector.broadcast %87 : vector<1x32xf32> to vector<2x32xf32>
    %89 = arith.addf %86, %88 : vector<2x32xf32>
    %c0_66 = arith.constant 0 : index
    %c0_67 = arith.constant 0 : index
    %90 = vector.load %arg6[%c0_66, %c0_67] : memref<32x32xf32, #tpu.memory_space<vmem>>, vector<32x32xf32>
    %cst_68 = arith.constant dense<0.000000e+00> : vector<2x32xf32>
    %91 = tpu.matmul %77, %90, %cst_68 {dimension_numbers = #tpu.dot_dimension_numbers<[1], [0], [0], [1], [0, 0, 1, 1], [], []>} : vector<2x32xf32>, vector<32x32xf32>, vector<2x32xf32> -> vector<2x32xf32>
    %92 = arith.addf %89, %91 : vector<2x32xf32>
    %93 = math.tanh %92 : vector<2x32xf32>
    %c0_69 = arith.constant 0 : index
    %c128 = arith.constant 128 : index
    %94 = vector.load %arg17[%c0_69, %c128] : memref<2x256xf32, #tpu.memory_space<vmem>>, vector<2x32xf32>
    tpu.vector_store %arg17[%c0_69, %c128], %93 {strides = array<i32>} : memref<2x256xf32, #tpu.memory_space<vmem>>, vector<2x32xf32>,
    %95 = vector.extract_strided_slice %10 {offsets = [0, 5, 0], sizes = [2, 1, 32], strides = [1, 1, 1]} : vector<2x8x32xf32> to vector<2x1x32xf32>
    %96 = vector.shape_cast %95 : vector<2x1x32xf32> to vector<2x32xf32>
    %c0_70 = arith.constant 0 : index
    %c0_71 = arith.constant 0 : index
    %97 = vector.load %arg3[%c0_70, %c0_71] : memref<32x32xf32, #tpu.memory_space<vmem>>, vector<32x32xf32>
    %cst_72 = arith.constant dense<0.000000e+00> : vector<2x32xf32>
    %98 = tpu.matmul %84, %97, %cst_72 {dimension_numbers = #tpu.dot_dimension_numbers<[1], [0], [0], [1], [0, 0, 1, 1], [], []>} : vector<2x32xf32>, vector<32x32xf32>, vector<2x32xf32> -> vector<2x32xf32>
    %99 = arith.addf %96, %98 : vector<2x32xf32>
    %100 = math.tanh %99 : vector<2x32xf32>
    %c0_73 = arith.constant 0 : index
    %c0_74 = arith.constant 0 : index
    %101 = vector.load %arg5[%c0_73, %c0_74] : memref<32x32xf32, #tpu.memory_space<vmem>>, vector<32x32xf32>
    %cst_75 = arith.constant dense<0.000000e+00> : vector<2x32xf32>
    %102 = tpu.matmul %100, %101, %cst_75 {dimension_numbers = #tpu.dot_dimension_numbers<[1], [0], [0], [1], [0, 0, 1, 1], [], []>} : vector<2x32xf32>, vector<32x32xf32>, vector<2x32xf32> -> vector<2x32xf32>
    %c0_76 = arith.constant 0 : index
    %c0_77 = arith.constant 0 : index
    %103 = vector.load %arg7[%c0_76, %c0_77] : memref<1x32xf32, #tpu.memory_space<vmem>>, vector<1x32xf32>
    %104 = vector.broadcast %103 : vector<1x32xf32> to vector<2x32xf32>
    %105 = arith.addf %102, %104 : vector<2x32xf32>
    %c0_78 = arith.constant 0 : index
    %c0_79 = arith.constant 0 : index
    %106 = vector.load %arg6[%c0_78, %c0_79] : memref<32x32xf32, #tpu.memory_space<vmem>>, vector<32x32xf32>
    %cst_80 = arith.constant dense<0.000000e+00> : vector<2x32xf32>
    %107 = tpu.matmul %93, %106, %cst_80 {dimension_numbers = #tpu.dot_dimension_numbers<[1], [0], [0], [1], [0, 0, 1, 1], [], []>} : vector<2x32xf32>, vector<32x32xf32>, vector<2x32xf32> -> vector<2x32xf32>
    %108 = arith.addf %105, %107 : vector<2x32xf32>
    %109 = math.tanh %108 : vector<2x32xf32>
    %c0_81 = arith.constant 0 : index
    %c160 = arith.constant 160 : index
    %110 = vector.load %arg17[%c0_81, %c160] : memref<2x256xf32, #tpu.memory_space<vmem>>, vector<2x32xf32>
    tpu.vector_store %arg17[%c0_81, %c160], %109 {strides = array<i32>} : memref<2x256xf32, #tpu.memory_space<vmem>>, vector<2x32xf32>,
    %111 = vector.extract_strided_slice %10 {offsets = [0, 6, 0], sizes = [2, 1, 32], strides = [1, 1, 1]} : vector<2x8x32xf32> to vector<2x1x32xf32>
    %112 = vector.shape_cast %111 : vector<2x1x32xf32> to vector<2x32xf32>
    %c0_82 = arith.constant 0 : index
    %c0_83 = arith.constant 0 : index
    %113 = vector.load %arg3[%c0_82, %c0_83] : memref<32x32xf32, #tpu.memory_space<vmem>>, vector<32x32xf32>
    %cst_84 = arith.constant dense<0.000000e+00> : vector<2x32xf32>
    %114 = tpu.matmul %100, %113, %cst_84 {dimension_numbers = #tpu.dot_dimension_numbers<[1], [0], [0], [1], [0, 0, 1, 1], [], []>} : vector<2x32xf32>, vector<32x32xf32>, vector<2x32xf32> -> vector<2x32xf32>
    %115 = arith.addf %112, %114 : vector<2x32xf32>
    %116 = math.tanh %115 : vector<2x32xf32>
    %c0_85 = arith.constant 0 : index
    %c0_86 = arith.constant 0 : index
    %117 = vector.load %arg5[%c0_85, %c0_86] : memref<32x32xf32, #tpu.memory_space<vmem>>, vector<32x32xf32>
    %cst_87 = arith.constant dense<0.000000e+00> : vector<2x32xf32>
    %118 = tpu.matmul %116, %117, %cst_87 {dimension_numbers = #tpu.dot_dimension_numbers<[1], [0], [0], [1], [0, 0, 1, 1], [], []>} : vector<2x32xf32>, vector<32x32xf32>, vector<2x32xf32> -> vector<2x32xf32>
    %c0_88 = arith.constant 0 : index
    %c0_89 = arith.constant 0 : index
    %119 = vector.load %arg7[%c0_88, %c0_89] : memref<1x32xf32, #tpu.memory_space<vmem>>, vector<1x32xf32>
    %120 = vector.broadcast %119 : vector<1x32xf32> to vector<2x32xf32>
    %121 = arith.addf %118, %120 : vector<2x32xf32>
    %c0_90 = arith.constant 0 : index
    %c0_91 = arith.constant 0 : index
    %122 = vector.load %arg6[%c0_90, %c0_91] : memref<32x32xf32, #tpu.memory_space<vmem>>, vector<32x32xf32>
    %cst_92 = arith.constant dense<0.000000e+00> : vector<2x32xf32>
    %123 = tpu.matmul %109, %122, %cst_92 {dimension_numbers = #tpu.dot_dimension_numbers<[1], [0], [0], [1], [0, 0, 1, 1], [], []>} : vector<2x32xf32>, vector<32x32xf32>, vector<2x32xf32> -> vector<2x32xf32>
    %124 = arith.addf %121, %123 : vector<2x32xf32>
    %125 = math.tanh %124 : vector<2x32xf32>
    %c0_93 = arith.constant 0 : index
    %c192 = arith.constant 192 : index
    %126 = vector.load %arg17[%c0_93, %c192] : memref<2x256xf32, #tpu.memory_space<vmem>>, vector<2x32xf32>
    tpu.vector_store %arg17[%c0_93, %c192], %125 {strides = array<i32>} : memref<2x256xf32, #tpu.memory_space<vmem>>, vector<2x32xf32>,
    %127 = vector.extract_strided_slice %10 {offsets = [0, 7, 0], sizes = [2, 1, 32], strides = [1, 1, 1]} : vector<2x8x32xf32> to vector<2x1x32xf32>
    %128 = vector.shape_cast %127 : vector<2x1x32xf32> to vector<2x32xf32>
    %c0_94 = arith.constant 0 : index
    %c0_95 = arith.constant 0 : index
    %129 = vector.load %arg3[%c0_94, %c0_95] : memref<32x32xf32, #tpu.memory_space<vmem>>, vector<32x32xf32>
    %cst_96 = arith.constant dense<0.000000e+00> : vector<2x32xf32>
    %130 = tpu.matmul %116, %129, %cst_96 {dimension_numbers = #tpu.dot_dimension_numbers<[1], [0], [0], [1], [0, 0, 1, 1], [], []>} : vector<2x32xf32>, vector<32x32xf32>, vector<2x32xf32> -> vector<2x32xf32>
    %131 = arith.addf %128, %130 : vector<2x32xf32>
    %132 = math.tanh %131 : vector<2x32xf32>
    %c0_97 = arith.constant 0 : index
    %c0_98 = arith.constant 0 : index
    %133 = vector.load %arg5[%c0_97, %c0_98] : memref<32x32xf32, #tpu.memory_space<vmem>>, vector<32x32xf32>
    %cst_99 = arith.constant dense<0.000000e+00> : vector<2x32xf32>
    %134 = tpu.matmul %132, %133, %cst_99 {dimension_numbers = #tpu.dot_dimension_numbers<[1], [0], [0], [1], [0, 0, 1, 1], [], []>} : vector<2x32xf32>, vector<32x32xf32>, vector<2x32xf32> -> vector<2x32xf32>
    %c0_100 = arith.constant 0 : index
    %c0_101 = arith.constant 0 : index
    %135 = vector.load %arg7[%c0_100, %c0_101] : memref<1x32xf32, #tpu.memory_space<vmem>>, vector<1x32xf32>
    %136 = vector.broadcast %135 : vector<1x32xf32> to vector<2x32xf32>
    %137 = arith.addf %134, %136 : vector<2x32xf32>
    %c0_102 = arith.constant 0 : index
    %c0_103 = arith.constant 0 : index
    %138 = vector.load %arg6[%c0_102, %c0_103] : memref<32x32xf32, #tpu.memory_space<vmem>>, vector<32x32xf32>
    %cst_104 = arith.constant dense<0.000000e+00> : vector<2x32xf32>
    %139 = tpu.matmul %125, %138, %cst_104 {dimension_numbers = #tpu.dot_dimension_numbers<[1], [0], [0], [1], [0, 0, 1, 1], [], []>} : vector<2x32xf32>, vector<32x32xf32>, vector<2x32xf32> -> vector<2x32xf32>
    %140 = arith.addf %137, %139 : vector<2x32xf32>
    %141 = math.tanh %140 : vector<2x32xf32>
    %c0_105 = arith.constant 0 : index
    %c224 = arith.constant 224 : index
    %142 = vector.load %arg17[%c0_105, %c224] : memref<2x256xf32, #tpu.memory_space<vmem>>, vector<2x32xf32>
    tpu.vector_store %arg17[%c0_105, %c224], %141 {strides = array<i32>} : memref<2x256xf32, #tpu.memory_space<vmem>>, vector<2x32xf32>,
    %c0_106 = arith.constant 0 : index
    %c0_107 = arith.constant 0 : index
    %143 = vector.load %arg17[%c0_106, %c0_107] : memref<2x256xf32, #tpu.memory_space<vmem>>, vector<2x256xf32>
    %c0_108 = arith.constant 0 : index
    %c0_109 = arith.constant 0 : index
    %144 = vector.load %arg8[%c0_108, %c0_109] : memref<256x512xf32, #tpu.memory_space<vmem>>, vector<256x512xf32>
    %cst_110 = arith.constant dense<0.000000e+00> : vector<2x512xf32>
    %145 = tpu.matmul %143, %144, %cst_110 {dimension_numbers = #tpu.dot_dimension_numbers<[1], [0], [0], [1], [0, 0, 1, 1], [], []>} : vector<2x256xf32>, vector<256x512xf32>, vector<2x512xf32> -> vector<2x512xf32>
    %c0_111 = arith.constant 0 : index
    %c0_112 = arith.constant 0 : index
    %146 = vector.load %arg9[%c0_111, %c0_112] : memref<1x512xf32, #tpu.memory_space<vmem>>, vector<1x512xf32>
    %147 = vector.broadcast %146 : vector<1x512xf32> to vector<2x512xf32>
    %148 = arith.addf %145, %147 : vector<2x512xf32>
    %c0_113 = arith.constant 0 : index
    %c0_114 = arith.constant 0 : index
    %149 = vector.load %arg10[%c0_113, %c0_114] : memref<1x512xf32, #tpu.memory_space<vmem>>, vector<1x512xf32>
    %c0_115 = arith.constant 0 : index
    %c0_116 = arith.constant 0 : index
    %150 = vector.load %arg11[%c0_115, %c0_116] : memref<1x512xf32, #tpu.memory_space<vmem>>, vector<1x512xf32>
    %cst_117 = arith.constant dense<0.000000e+00> : vector<2xf32>
    %151 = vector.multi_reduction <add>, %148, %cst_117 [1] : vector<2x512xf32> to vector<2xf32>
    %152 = vector.shape_cast %151 : vector<2xf32> to vector<2x1xf32>
    %cst_118 = arith.constant 5.120000e+02 : f32
    %153 = vector.broadcast %cst_118 : f32 to vector<2x1xf32>
    %154 = arith.divf %152, %153 : vector<2x1xf32>
    %155 = vector.broadcast %154 : vector<2x1xf32> to vector<2x512xf32>
    %156 = arith.subf %148, %155 : vector<2x512xf32>
    %157 = arith.mulf %156, %156 : vector<2x512xf32>
    %cst_119 = arith.constant dense<0.000000e+00> : vector<2xf32>
    %158 = vector.multi_reduction <add>, %157, %cst_119 [1] : vector<2x512xf32> to vector<2xf32>
    %159 = vector.shape_cast %158 : vector<2xf32> to vector<2x1xf32>
    %cst_120 = arith.constant 5.120000e+02 : f32
    %160 = vector.broadcast %cst_120 : f32 to vector<2x1xf32>
    %161 = arith.divf %159, %160 : vector<2x1xf32>
    %162 = vector.broadcast %154 : vector<2x1xf32> to vector<2x512xf32>
    %163 = arith.subf %148, %162 : vector<2x512xf32>
    %cst_121 = arith.constant 9.99999974E-6 : f32
    %164 = vector.broadcast %cst_121 : f32 to vector<2x1xf32>
    %165 = arith.addf %161, %164 : vector<2x1xf32>
    %166 = math.rsqrt %165 : vector<2x1xf32>
    %167 = vector.broadcast %166 : vector<2x1xf32> to vector<2x512xf32>
    %168 = arith.mulf %163, %167 : vector<2x512xf32>
    %169 = vector.broadcast %149 : vector<1x512xf32> to vector<2x512xf32>
    %170 = arith.mulf %168, %169 : vector<2x512xf32>
    %171 = vector.broadcast %150 : vector<1x512xf32> to vector<2x512xf32>
    %172 = arith.addf %170, %171 : vector<2x512xf32>
    %cst_122 = arith.constant 0.000000e+00 : f32
    %173 = vector.broadcast %cst_122 : f32 to vector<2x512xf32>
    %174 = arith.maximumf %172, %173 : vector<2x512xf32>
    %c0_123 = arith.constant 0 : index
    %c0_124 = arith.constant 0 : index
    %175 = vector.load %arg12[%c0_123, %c0_124] : memref<512x4xf32, #tpu.memory_space<vmem>>, vector<512x4xf32>
    %cst_125 = arith.constant dense<0.000000e+00> : vector<2x4xf32>
    %176 = tpu.matmul %174, %175, %cst_125 {dimension_numbers = #tpu.dot_dimension_numbers<[1], [0], [0], [1], [0, 0, 1, 1], [], []>} : vector<2x512xf32>, vector<512x4xf32>, vector<2x4xf32> -> vector<2x4xf32>
    %c0_126 = arith.constant 0 : index
    %c0_127 = arith.constant 0 : index
    %177 = vector.load %arg13[%c0_126, %c0_127] : memref<1x4xf32, #tpu.memory_space<vmem>>, vector<1x4xf32>
    %178 = vector.broadcast %177 : vector<1x4xf32> to vector<2x4xf32>
    %179 = arith.addf %176, %178 : vector<2x4xf32>
    %c0_128 = arith.constant 0 : index
    %c0_129 = arith.constant 0 : index
    %180 = vector.load %arg14[%c0_128, %c0_129] : memref<1x4xf32, #tpu.memory_space<vmem>>, vector<1x4xf32>
    %c0_130 = arith.constant 0 : index
    %c0_131 = arith.constant 0 : index
    %181 = vector.load %arg15[%c0_130, %c0_131] : memref<1x4xf32, #tpu.memory_space<vmem>>, vector<1x4xf32>
    %cst_132 = arith.constant dense<0.000000e+00> : vector<2xf32>
    %182 = vector.multi_reduction <add>, %179, %cst_132 [1] : vector<2x4xf32> to vector<2xf32>
    %183 = vector.shape_cast %182 : vector<2xf32> to vector<2x1xf32>
    %cst_133 = arith.constant 4.000000e+00 : f32
    %184 = vector.broadcast %cst_133 : f32 to vector<2x1xf32>
    %185 = arith.divf %183, %184 : vector<2x1xf32>
    %186 = vector.broadcast %185 : vector<2x1xf32> to vector<2x4xf32>
    %187 = arith.subf %179, %186 : vector<2x4xf32>
    %188 = arith.mulf %187, %187 : vector<2x4xf32>
    %cst_134 = arith.constant dense<0.000000e+00> : vector<2xf32>
    %189 = vector.multi_reduction <add>, %188, %cst_134 [1] : vector<2x4xf32> to vector<2xf32>
    %190 = vector.shape_cast %189 : vector<2xf32> to vector<2x1xf32>
    %cst_135 = arith.constant 4.000000e+00 : f32
    %191 = vector.broadcast %cst_135 : f32 to vector<2x1xf32>
    %192 = arith.divf %190, %191 : vector<2x1xf32>
    %193 = vector.broadcast %185 : vector<2x1xf32> to vector<2x4xf32>
    %194 = arith.subf %179, %193 : vector<2x4xf32>
    %cst_136 = arith.constant 9.99999974E-6 : f32
    %195 = vector.broadcast %cst_136 : f32 to vector<2x1xf32>
    %196 = arith.addf %192, %195 : vector<2x1xf32>
    %197 = math.rsqrt %196 : vector<2x1xf32>
    %198 = vector.broadcast %197 : vector<2x1xf32> to vector<2x4xf32>
    %199 = arith.mulf %194, %198 : vector<2x4xf32>
    %200 = vector.broadcast %180 : vector<1x4xf32> to vector<2x4xf32>
    %201 = arith.mulf %199, %200 : vector<2x4xf32>
    %202 = vector.broadcast %181 : vector<1x4xf32> to vector<2x4xf32>
    %203 = arith.addf %201, %202 : vector<2x4xf32>
    %c0_137 = arith.constant 0 : index
    %c0_138 = arith.constant 0 : index
    %204 = vector.load %arg16[%c0_137, %c0_138] : memref<2x4xf32, #tpu.memory_space<vmem>>, vector<2x4xf32>
    tpu.vector_store %arg16[%c0_137, %c0_138], %203 {strides = array<i32>} : memref<2x4xf32, #tpu.memory_space<vmem>>, vector<2x4xf32>,
    return
  }
}

</mosaic_0001>

<bundles_post_ra>
// kernel: _lambda_.1
= control target key start
LH: loop header
LB: loop body
LE: loop exit
PB: predicated region body
PF: predicated region fallthrough
CT: control target
= control target key end

     0   :  { %s4438_s0 = inlined_call_operand.vmem [shape: f32[2,8], index: 0, kind: input, shape index: {}]   ;;  %s4439_s1 = inlined_call_operand.vmem [shape: f32[2,2,32], index: 1, kind: input, shape index: {}]   ;;  %s4440_s2 = inlined_call_operand.vmem [shape: f32[1,32], index: 2, kind: input, shape index: {}]   ;;  %s4441_s3 = inlined_call_operand.hbm [shape: f32[32,32], index: 3, kind: input, shape index: {}]   ;;  %s4442_s4 = inlined_call_operand.vmem [shape: f32[1,32], index: 4, kind: input, shape index: {}]   ;;  %s4443_s5 = inlined_call_operand.hbm [shape: f32[32,32], index: 5, kind: input, shape index: {}]   ;;  %s4444_s6 = inlined_call_operand.vmem [shape: f32[32,32], index: 6, kind: input, shape index: {}]   ;;  %s4445_s7 = inlined_call_operand.vmem [shape: f32[1,32], index: 7, kind: input, shape index: {}]   ;;  %s4446_s8 = inlined_call_operand.hbm [shape: f32[256,512], index: 8, kind: input, shape index: {}]   ;;  %s4447_s9 = inlined_call_operand.vmem [shape: f32[1,512], index: 9, kind: input, shape index: {}]   ;;  %s4448_s10 = inlined_call_operand.vmem [shape: f32[1,512], index: 10, kind: input, shape index: {}]   ;;  %s4449_s11 = inlined_call_operand.vmem [shape: f32[1,512], index: 11, kind: input, shape index: {}]   ;;  %s4450_s12 = inlined_call_operand.hbm [shape: f32[512,4], index: 12, kind: input, shape index: {}]   ;;  %s4451_s13 = inlined_call_operand.vmem [shape: f32[1,4], index: 13, kind: input, shape index: {}]   ;;  %s4452_s14 = inlined_call_operand.vmem [shape: f32[1,4], index: 14, kind: input, shape index: {}]   ;;  %s4453_s15 = inlined_call_operand.vmem [shape: f32[1,4], index: 15, kind: input, shape index: {}]   ;;  %s4454_s16 = inlined_call_operand.hbm [shape: f32[2,4], index: 16, kind: output, shape index: {}]  }
   0x1   :  { %4455 = sst [smem:[#allocation16_spill]] %s4438_s0 }
   0x2   :  { %21 = vsyncpa [#allocation4], 0 }
   0x3   :  { %22 = vsyncpa [#allocation7], 0 }
   0x4   :  { %23 = vsyncpa [#allocation10], 0 }
   0x5   :  { %24 = vsyncpa [#allocation5], 0  ;;  %s3913_s21 = smov [#allocation6]   ;;  %s3914_s23 = smov [#allocation3]  }
   0x6   :  { %s50_s22 = sshll.u32 %s3913_s21, 4  ;;  %s36_s24 = sshll.u32 %s3914_s23, 4  ;;  %s51_s22 = int_to_ptr.vmem [resolvable:$true] %s50_s22  ;;  %s4013_s24 = int_to_ptr.vmem [resolvable:$true] %s36_s24 }
   0x7   :  { %s3795_s27 = scalar_lea.hbm %s4443_s5, 512 }
   0x8   :  { %p3796_p0 = scmp.ne.s32.totalorder %s4443_s5, %s3795_s27  ;;  %p3799_p1 = scmp.lt.u32.totalorder %s3795_s27, %s4443_s5 }
   0xa   :  { %p3801_p2 = pnand %p3799_p1, %p3796_p0 }
   0xc   :  { %3804 = shalt.err (!%p3801_p2)
}
   0xd   :  { %s3805_s17 = scalar_lea.vmem %s51_s22, 512  ;;  %p3810_p4 = scmp.lt.s32.totalorder %s51_s22, %s51_s22 }
   0xe   :  { %p3806_p3 = scmp.ne.s32.totalorder %s51_s22, %s3805_s17  ;;  %p3811_p5 = scmp.lt.s32.totalorder %s3805_s17, %s3805_s17 }
  0x10   :  { %p3812_p6 = por %p3811_p5, %p3810_p4 }
  0x12   :  { %p3813_p7 = pnand %p3812_p6, %p3806_p3 }
  0x14   :  { %3816 = shalt.err (!%p3813_p7)
}
  0x15   :  { %s3915_s18 = smov 128   ;;  %s3916_s19 = smov 8  }
  0x16   :  { %56 = dma.hbm_to_vmem [thread:$0]  %s4443_s5, 512, %s51_s22, [#allocation7], %s3915_s18, %s3915_s18, %s3916_s19  }
  0x17   :  { %s3817_s26 = scalar_lea.hbm %s4441_s3, 512 }
  0x18   :  { %p3818_p8 = scmp.ne.s32.totalorder %s4441_s3, %s3817_s26  ;;  %p3821_p9 = scmp.lt.u32.totalorder %s3817_s26, %s4441_s3 }
  0x1a   :  { %p3823_p10 = pnand %p3821_p9, %p3818_p8 }
  0x1c   :  { %3826 = shalt.err (!%p3823_p10)
}
  0x1d   :  { %s3827_s0 = scalar_lea.vmem %s4013_s24, 512  ;;  %p3832_p12 = scmp.lt.s32.totalorder %s4013_s24, %s4013_s24 }
  0x1e   :  { %p3828_p11 = scmp.ne.s32.totalorder %s4013_s24, %s3827_s0  ;;  %p3833_p13 = scmp.lt.s32.totalorder %s3827_s0, %s3827_s0 }
  0x20   :  { %p3834_p0 = por %p3833_p13, %p3832_p12 }
  0x22   :  { %p3835_p1 = pnand %p3834_p0, %p3828_p11 }
  0x24   :  { %3838 = shalt.err (!%p3835_p1)
}
  0x25   :  { %42 = dma.hbm_to_vmem [thread:$0]  %s4441_s3, 512, %s4013_s24, [#allocation4], %s3915_s18, %s3915_s18, %s3916_s19  }
  0x26   :  { %s3917_s17 = smov [#allocation8]   ;;  %s3839_s25 = scalar_lea.hbm %s4446_s8, 16384 }
  0x27   :  { %s66_s20 = sshll.u32 %s3917_s17, 4  ;;  %p3840_p2 = scmp.ne.s32.totalorder %s4446_s8, %s3839_s25  ;;  %s67_s20 = int_to_ptr.vmem [resolvable:$true] %s66_s20 }
  0x28   :  { %p3843_p3 = scmp.lt.u32.totalorder %s3839_s25, %s4446_s8 }
  0x2a   :  { %p3845_p4 = pnand %p3843_p3, %p3840_p2 }
  0x2c   :  { %3848 = shalt.err (!%p3845_p4)
}
  0x2d   :  { %s3849_s30 = scalar_lea.vmem %s67_s20, 16384  ;;  %p3854_p6 = scmp.lt.s32.totalorder %s67_s20, %s67_s20 }
  0x2e   :  { %p3850_p5 = scmp.ne.s32.totalorder %s67_s20, %s3849_s30  ;;  %p3855_p7 = scmp.lt.s32.totalorder %s3849_s30, %s3849_s30 }
  0x30   :  { %p3856_p8 = por %p3855_p7, %p3854_p6 }
  0x32   :  { %p3857_p9 = pnand %p3856_p8, %p3850_p5 }
  0x34   :  { %3860 = shalt.err (!%p3857_p9)
}
  0x35   :  { %s3918_s3 = smov 512   ;;  %s3919_s24 = smov 32  }
  0x36   :  { %72 = dma.hbm_to_vmem [thread:$0]  %s4446_s8, 16384, %s67_s20, [#allocation7], %s3918_s3, %s3918_s3, %s3919_s24  }
  0x37   :  { %s3920_s22 = smov [#allocation9]   ;;  %s3861_s25 = scalar_lea.hbm %s4450_s12, 8192 }
  0x38   :  { %s84_s17 = sshll.u32 %s3920_s22, 4  ;;  %p3862_p10 = scmp.ne.s32.totalorder %s4450_s12, %s3861_s25  ;;  %s85_s17 = int_to_ptr.vmem [resolvable:$true] %s84_s17 }
  0x39   :  { %p3865_p11 = scmp.lt.u32.totalorder %s3861_s25, %s4450_s12 }
  0x3b   :  { %p3867_p12 = pnand %p3865_p11, %p3862_p10 }
  0x3d   :  { %3870 = shalt.err (!%p3867_p12)
}
  0x3e   :  { %s3871_s30 = scalar_lea.vmem %s85_s17, 8192  ;;  %p3876_p0 = scmp.lt.s32.totalorder %s85_s17, %s85_s17 }
  0x3f   :  { %p3872_p13 = scmp.ne.s32.totalorder %s85_s17, %s3871_s30  ;;  %p3877_p1 = scmp.lt.s32.totalorder %s3871_s30, %s3871_s30 }
  0x41   :  { %p3878_p2 = por %p3877_p1, %p3876_p0 }
  0x43   :  { %p3879_p3 = pnand %p3878_p2, %p3872_p13 }
  0x45   :  { %3882 = shalt.err (!%p3879_p3)
}
  0x46   :  { %90 = dma.hbm_to_vmem [thread:$0]  %s4450_s12, 8192, %s85_s17, [#allocation10], %s3915_s18, %s3915_s18, %s3916_s19  }
  0x47   :  { %3905 = dma.done.wait [#allocation4], 512  }
  0x48   :  { %3906 = vsyncadd [#allocation4], 4294966784 }
  0x49   :  { %3907 = dma.done.wait [#allocation7], 16896  }
  0x4a   :  { %3908 = vsyncadd [#allocation7], 4294950400 }
  0x4b   :  { %3909 = dma.done.wait [#allocation10], 8192  }
  0x4c   :  { %3910 = vsyncadd [#allocation10], 4294959104  ;;  %v3921_v0 = vmov 0.0|0.0   ;;  %vm3922_vm0 = vmmov 0   ;;  %v3923_v1 = vmov 0.0   ;;  %v110_v2 = vlaneseq  ;;  %v145_v5 = vld [vmem:[#allocation3] sm:$0xff] }
  0x4d   :  { %3368 = vmatprep.subr.bf16.mxu1 %v3921_v0  ;;  %3112 = vmatprep.mubr.msk.f32.mxu1 %vm3922_vm0, %v3923_v1  ;;  %v146_v6 = vld [vmem:[#allocation3 + $0x8] sm:$0xff]  ;;  %v147_v7 = vld [vmem:[#allocation3 + $0x10] sm:$0xff]  ;;  %v148_v10 = vld [vmem:[#allocation3 + $0x18] sm:$0xff]  ;;  %s4456_s19 = sld [smem:[#allocation16_spill]]  ;;  %vm149_vm1 = vcmask 261120   ;;  %vm245_vm2 = vcmask 1041409  }
  0x4e   :  { %3386 = vmatprep.subr.bf16.mxu0 %v3921_v0  ;;  %3145 = vmatprep.mubr.msk.f32.mxu0 %vm3922_vm0, %v3923_v1  ;;  %v4084_v3 = vshrl.u32 %v110_v2, 7  ;;  %v4092_v9 = vpack.c.bf16 %v146_v6, %v145_v5  ;;  %v4099_v13 = vpack.c.bf16 %v148_v10, %v147_v7  ;;  %v142_v15 = vld [vmem:[%s4439_s1] sm:$0x3]  ;;  %v231_v16 = vld [vmem:[#allocation6] sm:$0xff]  ;;  %v232_v17 = vld [vmem:[#allocation6 + $0x8] sm:$0xff]  ;;  %vm398_vm3 = vcmask 254976  }
  0x4f   :  { %v4115_v18 = vpack.c.bf16 %v232_v17, %v231_v16  ;;  %v233_v19 = vld [vmem:[#allocation6 + $0x10] sm:$0xff]  ;;  %v234_v20 = vld [vmem:[#allocation6 + $0x18] sm:$0xff]  ;;  %v320_v36 = vld [vmem:[%s4444_s6 + $0x8] sm:$0xff]  ;;  %vm659_vm4 = vcmask 517376   ;;  %vm921_vm5 = vcmask 779776   ;;  %s3926_s20 = smov 96  }
  0x50   :  { %v4087_v4 = vsub.s32 1, %v4084_v3  ;;  %v4090_v8 = vsub.s32 0, %v4084_v3  ;;  %3370 = vmatpush3.bf16.msra.mxu1 %v4092_v9  ;;  %3388 = vmatpush3.bf16.msra.mxu0 %v4092_v9  ;;  %v4119_v21 = vpack.c.bf16 %v234_v20, %v233_v19  ;;  %v2875_v23 = vld [vmem:[%s4440_s2] ss:$0 sm:$0xff]  ;;  %v321_v41 = vld [vmem:[%s4444_s6 + $0x10] sm:$0xff]  ;;  %v322_v42 = vld [vmem:[%s4444_s6 + $0x18] sm:$0xff] }
  0x51   :  { %3371 = vmatprep.subr.bf16.mxu1 %v3921_v0  ;;  %3389 = vmatprep.subr.bf16.mxu0 %v3921_v0  ;;  %v2876_v26 = vld [vmem:[%s4442_s4] ss:$0 sm:$0xff]  ;;  %v4153_v44 = vpack.c.bf16 %v322_v42, %v321_v41  ;;  %v2877_v45 = vld [vmem:[%s4439_s1 + $0x2] sm:$0x3]  ;;  %vm1183_vm6 = vcmask 1042176   ;;  %vm2525_vm7 = vcmask 1041408  }
  0x52   :  { %v319_v35 = vld [vmem:[%s4444_s6] sm:$0xff]  ;;  %vm2828_vm8 = vcmask 25600   ;;  %s3927_s17 = smov [#allocation11]  }
  0x53   :  { %v109_v11 = vld [vmem:[%s4456_s19] sm:$0x3]  ;;  %v4141_v39 = vpack.c.bf16 %v320_v36, %v319_v35  ;;  %s2864_s21 = sshll.u32 %s3927_s17, 4  ;;  %s2865_s21 = int_to_ptr.vmem [resolvable:$true] %s2864_s21 }
  0x54   :  { %v120_v12 = vrot.slane %v109_v11, %v4087_v4  ;;  %v113_v14 = vrot.slane %v109_v11, %v4090_v8  ;;  %3373 = vmatpush3.bf16.msra.mxu1 %v4099_v13  ;;  %3391 = vmatpush3.bf16.msra.mxu0 %v4099_v13  ;;  %v4181_v51 = vld [vmem:[%s4445_s7] ss:$0 sm:$0xff]  ;;  %v3924_v11 = vmov 1983009808   ;;  %s3925_s7 = smov 64   ;;  %s3883_s2 = scalar_lea.vmem %s2865_s21, 32 }
  0x55   :  { %3374 = vmatprep.subr.bf16.mxu1 %v3921_v0  ;;  %3392 = vmatprep.subr.bf16.mxu0 %v3921_v0  ;;  %p3884_p4 = scmp.ne.s32.totalorder %s2865_s21, %s3883_s2  ;;  %p3888_p5 = scmp.lt.s32.totalorder %s2865_s21, %s2865_s21 }
  0x56   :  { %122 = vbcast.lane.b32.xlu0 %v120_v12, 256  ;;  %v650_v12 = vunpack.c.l.s4 %v3924_v11  ;;  %p3889_p6 = scmp.lt.s32.totalorder %s3883_s2, %s3883_s2 }
  0x57   :  { %3113 = vmatmul.mubr.msk.f32.vlgmr.msra.gmra.mrb[0].mxu1 %vm149_vm1, %v142_v15 }
  0x58   :  { %3123 = vmatprep.mubr.msk.f32.mxu1 %vm3922_vm0, %v3923_v1  ;;  %3376 = vmatpush3.bf16.msra.mxu1 %v4115_v18  ;;  %p3890_p7 = por %p3889_p6, %p3888_p5 }
  0x59   :  { %3377 = vmatprep.subr.bf16.mxu1 %v3921_v0 }
  0x5a   :  { %115 = vbcast.lane.b32.xlu0 %v113_v14, 256  ;;  %v651_v14 = vunpack.c.0.s8 %v650_v12  ;;  %p3891_p8 = pnand %p3890_p7, %p3884_p4 }
  0x5c   :  { %3379 = vmatpush3.bf16.msra.mxu1 %v4119_v21  ;;  %v4211_v20 = vsub.s32 %v651_v14, %v4084_v3 }
  0x5d   :  { %3380 = vmatprep.subr.bf16.mxu1 %v3921_v0 }
  0xc8   :  { %v123_v22 = vpop.permute.xlu0 %122 }
  0xc9   :  { %v132_v27 = vmul.f32 %v2875_v23, %v123_v22 }
  0xcb   :  { %v4131_v30 = vadd.f32 %v2876_v26, %v132_v27 }
  0xcc   :  { %v116_v24 = vpop.permute.xlu0 %115 }
  0xcd   :  { %v131_v25 = vmul.f32 %v2875_v23, %v116_v24 }
  0xcf   :  { %v4129_v28 = vadd.f32 %v2876_v26, %v131_v25 }
 0x12a   :  { %v219_v29 = vpop.f32.mrb[0].mxu1 }
 0x12b   :  { %v224_v31 = vrot.slane %v219_v29, 1  ;;  %v3114_v32 = vpop.f32.mrb[1].mxu1  ;;  %v227_v33 = vadd.f32 %v219_v29, %v4129_v28 }
 0x12d   :  { %v228_v34 = vadd.f32 %v224_v31, %v4131_v30 }
 0x12f   :  { %3743 = vtanh.f32 %v228_v34 }
 0x130   :  { %3745 = vtanh.f32 %v227_v33 }
 0x139   :  { %v3744_v37 = vpop.eup %3743 }
 0x13a   :  { %v244_v38 = vrot.slane %v3744_v37, 7  ;;  %v3746_v40 = vpop.eup %3745 }
 0x13c   :  { %v246_v43 = vsel %vm245_vm2, %v244_v38, %v3746_v40 }
 0x13d   :  { %3124 = vmatmul.mubr.msk.f32.vlgmr.msra.gmra.mrb[2].mxu1 %vm149_vm1, %v246_v43  ;;  %3146 = vmatmul.mubr.msk.f32.vlgmr.msra.gmra.mrb[0].mxu0 %vm149_vm1, %v246_v43 }
 0x13e   :  { %3382 = vmatpush3.bf16.msra.mxu1 %v4141_v39  ;;  %3134 = vmatprep.mubr.msk.f32.mxu1 %vm3922_vm0, %v3923_v1 }
 0x13f   :  { %3383 = vmatprep.subr.bf16.mxu1 %v3921_v0  ;;  %3394 = vmatpush3.bf16.msra.mxu0 %v4115_v18 }
 0x140   :  { %3395 = vmatprep.subr.bf16.mxu0 %v3921_v0  ;;  %3156 = vmatprep.mubr.msk.f32.mxu0 %vm3922_vm0, %v3923_v1 }
 0x142   :  { %3385 = vmatpush3.bf16.msra.mxu1 %v4153_v44 }
 0x143   :  { %3404 = vmatprep.subr.bf16.mxu1 %v3921_v0  ;;  %3397 = vmatpush3.bf16.msra.mxu0 %v4119_v21 }
 0x144   :  { %3398 = vmatprep.subr.bf16.mxu0 %v3921_v0 }
 0x145   :  { %3135 = vmatmul.mubr.msk.f32.vlgmr.msra.gmra.mrb[2].mxu1 %vm149_vm1, %v2877_v45 }
 0x146   :  { %3406 = vmatpush3.bf16.msra.mxu1 %v4092_v9  ;;  %3178 = vmatprep.mubr.msk.f32.mxu1 %vm3922_vm0, %v3923_v1 }
 0x147   :  { %3407 = vmatprep.subr.bf16.mxu1 %v3921_v0 }
 0x14a   :  { %3409 = vmatpush3.bf16.msra.mxu1 %v4099_v13 }
 0x14b   :  { %3410 = vmatprep.subr.bf16.mxu1 %v3921_v0 }
 0x210   :  { %v470_v46 = vpop.f32.mrb[0].mxu0 }
 0x211   :  { %v475_v47 = vrot.slane %v470_v46, 7  ;;  %v3147_v48 = vpop.f32.mrb[1].mxu0  ;;  %v479_v50 = vadd.f32 %v470_v46, %v4131_v30 }
 0x213   :  { %v478_v49 = vadd.f32 %v475_v47, %v4129_v28 }
 0x215   :  { %3747 = vtanh.f32 %v478_v49 }
 0x216   :  { %3749 = vtanh.f32 %v479_v50 }
 0x218   :  { %v392_v52 = vpop.f32.mrb[2].mxu1 }
 0x219   :  { %v3704_v53 = vadd.f32 %v4181_v51, %v392_v52  ;;  %v3136_v54 = vpop.f32.mrb[3].mxu1 }
 0x21b   :  { %3751 = vtanh.f32 %v3704_v53 }
 0x21f   :  { %v3748_v55 = vpop.eup %3747 }
 0x220   :  { %v495_v56 = vrot.slane %v3748_v55, 1  ;;  %v3750_v57 = vpop.eup %3749 }
 0x222   :  { %v496_v58 = vsel %vm245_vm2, %v3750_v57, %v495_v56 }
 0x223   :  { %3157 = vmatmul.mubr.msk.f32.vlgmr.msra.gmra.mrb[2].mxu0 %vm149_vm1, %v496_v58  ;;  %3179 = vmatmul.mubr.msk.f32.vlgmr.msra.gmra.mrb[4].mxu1 %vm149_vm1, %v496_v58 }
 0x224   :  { %3400 = vmatpush3.bf16.msra.mxu0 %v4141_v39  ;;  %3167 = vmatprep.mubr.msk.f32.mxu0 %vm3922_vm0, %v3923_v1 }
 0x225   :  { %v3752_v59 = vpop.eup %3751  ;;  %3401 = vmatprep.subr.bf16.mxu0 %v3921_v0  ;;  %3412 = vmatpush3.bf16.msra.mxu1 %v4115_v18 }
 0x226   :  { %3413 = vmatprep.subr.bf16.mxu1 %v3921_v0  ;;  %3189 = vmatprep.mubr.msk.f32.mxu1 %vm3922_vm0, %v3923_v1  ;;  %399 = vst.msk [vmem:[#allocation2] sm:$0x3] %vm398_vm3, %v3752_v59 }
 0x228   :  { %3403 = vmatpush3.bf16.msra.mxu0 %v4153_v44 }
 0x229   :  { %3422 = vmatprep.subr.bf16.mxu0 %v3921_v0  ;;  %3415 = vmatpush3.bf16.msra.mxu1 %v4119_v21 }
 0x22a   :  { %3416 = vmatprep.subr.bf16.mxu1 %v3921_v0 }
 0x22b   :  { %3168 = vmatmul.mubr.msk.f32.vlgmr.msra.gmra.mrb[2].mxu0 %vm149_vm1, %v3752_v59 }
 0x22c   :  { %3424 = vmatpush3.bf16.msra.mxu0 %v4092_v9  ;;  %3211 = vmatprep.mubr.msk.f32.mxu0 %vm3922_vm0, %v3923_v1 }
 0x22d   :  { %3425 = vmatprep.subr.bf16.mxu0 %v3921_v0 }
 0x230   :  { %3427 = vmatpush3.bf16.msra.mxu0 %v4099_v13 }
 0x231   :  { %3428 = vmatprep.subr.bf16.mxu0 %v3921_v0 }
 0x2f6   :  { %v731_v60 = vpop.f32.mrb[4].mxu1 }
 0x2f7   :  { %v736_v61 = vrot.slane %v731_v60, 6  ;;  %v737_v62 = vrot.slane %v731_v60, 7  ;;  %v3180_v63 = vpop.f32.mrb[5].mxu1 }
 0x2f9   :  { %v740_v2 = vadd.f32 %v736_v61, %v4129_v28  ;;  %v741_v5 = vadd.f32 %v737_v62, %v4131_v30 }
 0x2fb   :  { %3753 = vtanh.f32 %v740_v2 }
 0x2fc   :  { %3755 = vtanh.f32 %v741_v5 }
 0x2fe   :  { %v642_v6 = vpop.f32.mrb[2].mxu0 }
 0x2ff   :  { %v3705_v7 = vadd.f32 %v4181_v51, %v642_v6  ;;  %v3169_v10 = vpop.f32.mrb[3].mxu0 }
 0x301   :  { %3757 = vtanh.f32 %v3705_v7 }
 0x305   :  { %v3754_v15 = vpop.eup %3753 }
 0x306   :  { %v3756_v16 = vpop.eup %3755  ;;  %v757_v17 = vrot.slane %v3754_v15, 2 }
 0x307   :  { %v758_v19 = vrot.slane %v3756_v16, 1 }
 0x309   :  { %v759_v22 = vsel %vm245_vm2, %v758_v19, %v757_v17 }
 0x30a   :  { %3190 = vmatmul.mubr.msk.f32.vlgmr.msra.gmra.mrb[6].mxu1 %vm149_vm1, %v759_v22  ;;  %3212 = vmatmul.mubr.msk.f32.vlgmr.msra.gmra.mrb[4].mxu0 %vm149_vm1, %v759_v22 }
 0x30b   :  { %v3758_v23 = vpop.eup %3757  ;;  %3418 = vmatpush3.bf16.msra.mxu1 %v4141_v39  ;;  %3200 = vmatprep.mubr.msk.f32.mxu1 %vm3922_vm0, %v3923_v1 }
 0x30c   :  { %3419 = vmatprep.subr.bf16.mxu1 %v3921_v0  ;;  %v655_v24 = vrot.slane %v3758_v23, %v4211_v20  ;;  %3430 = vmatpush3.bf16.msra.mxu0 %v4115_v18 }
 0x30d   :  { %3431 = vmatprep.subr.bf16.mxu0 %v3921_v0  ;;  %3222 = vmatprep.mubr.msk.f32.mxu0 %vm3922_vm0, %v3923_v1 }
 0x30e   :  { %656 = vrot.lane.b32.xlu1 %v655_v24, %s3919_s24 }
 0x30f   :  { %3421 = vmatpush3.bf16.msra.mxu1 %v4153_v44 }
 0x310   :  { %3440 = vmatprep.subr.bf16.mxu1 %v3921_v0  ;;  %3433 = vmatpush3.bf16.msra.mxu0 %v4119_v21 }
 0x311   :  { %3434 = vmatprep.subr.bf16.mxu0 %v3921_v0 }
 0x312   :  { %3201 = vmatmul.mubr.msk.f32.vlgmr.msra.gmra.mrb[6].mxu1 %vm149_vm1, %v3758_v23 }
 0x313   :  { %3442 = vmatpush3.bf16.msra.mxu1 %v4092_v9  ;;  %3244 = vmatprep.mubr.msk.f32.mxu1 %vm3922_vm0, %v3923_v1 }
 0x314   :  { %3443 = vmatprep.subr.bf16.mxu1 %v3921_v0 }
 0x317   :  { %3445 = vmatpush3.bf16.msra.mxu1 %v4099_v13 }
 0x318   :  { %3446 = vmatprep.subr.bf16.mxu1 %v3921_v0 }
 0x380   :  { %v657_v25 = vpop.permute.xlu1 %656 }
 0x381   :  { %660 = vst.msk [vmem:[#allocation2] sm:$0x3] %vm659_vm4, %v657_v25 }
 0x3dd   :  { %v993_v26 = vpop.f32.mrb[4].mxu0 }
 0x3de   :  { %v998_v27 = vrot.slane %v993_v26, 5  ;;  %v999_v29 = vrot.slane %v993_v26, 6  ;;  %v3213_v31 = vpop.f32.mrb[5].mxu0 }
 0x3e0   :  { %v1002_v32 = vadd.f32 %v998_v27, %v4129_v28  ;;  %v1003_v33 = vadd.f32 %v999_v29, %v4131_v30 }
 0x3e2   :  { %3759 = vtanh.f32 %v1002_v32 }
 0x3e3   :  { %3761 = vtanh.f32 %v1003_v33 }
 0x3e5   :  { %v904_v34 = vpop.f32.mrb[6].mxu1 }
 0x3e6   :  { %v3706_v35 = vadd.f32 %v4181_v51, %v904_v34  ;;  %v3202_v36 = vpop.f32.mrb[7].mxu1 }
 0x3e8   :  { %3763 = vtanh.f32 %v3706_v35 }
 0x3ec   :  { %v3760_v37 = vpop.eup %3759 }
 0x3ed   :  { %v3762_v38 = vpop.eup %3761  ;;  %v1019_v40 = vrot.slane %v3760_v37, 3 }
 0x3ee   :  { %v1020_v41 = vrot.slane %v3762_v38, 2 }
 0x3f0   :  { %v1021_v42 = vsel %vm245_vm2, %v1020_v41, %v1019_v40 }
 0x3f1   :  { %3223 = vmatmul.mubr.msk.f32.vlgmr.msra.gmra.mrb[6].mxu0 %vm149_vm1, %v1021_v42  ;;  %3245 = vmatmul.mubr.msk.f32.vlgmr.msra.gmra.mrb[8].mxu1 %vm149_vm1, %v1021_v42 }
 0x3f2   :  { %v3764_v43 = vpop.eup %3763  ;;  %3436 = vmatpush3.bf16.msra.mxu0 %v4141_v39  ;;  %3233 = vmatprep.mubr.msk.f32.mxu0 %vm3922_vm0, %v3923_v1 }
 0x3f3   :  { %3437 = vmatprep.subr.bf16.mxu0 %v3921_v0  ;;  %v917_v45 = vrot.slane %v3764_v43, %v4211_v20  ;;  %3448 = vmatpush3.bf16.msra.mxu1 %v4115_v18 }
 0x3f4   :  { %3449 = vmatprep.subr.bf16.mxu1 %v3921_v0  ;;  %3255 = vmatprep.mubr.msk.f32.mxu1 %vm3922_vm0, %v3923_v1 }
 0x3f5   :  { %918 = vrot.lane.b32.xlu0 %v917_v45, %s3925_s7 }
 0x3f6   :  { %3439 = vmatpush3.bf16.msra.mxu0 %v4153_v44 }
 0x3f7   :  { %3458 = vmatprep.subr.bf16.mxu0 %v3921_v0  ;;  %3451 = vmatpush3.bf16.msra.mxu1 %v4119_v21 }
 0x3f8   :  { %3452 = vmatprep.subr.bf16.mxu1 %v3921_v0 }
 0x3f9   :  { %3234 = vmatmul.mubr.msk.f32.vlgmr.msra.gmra.mrb[6].mxu0 %vm149_vm1, %v3764_v43 }
 0x3fa   :  { %3460 = vmatpush3.bf16.msra.mxu0 %v4092_v9  ;;  %3277 = vmatprep.mubr.msk.f32.mxu0 %vm3922_vm0, %v3923_v1 }
 0x3fb   :  { %3461 = vmatprep.subr.bf16.mxu0 %v3921_v0 }
 0x3fe   :  { %3463 = vmatpush3.bf16.msra.mxu0 %v4099_v13 }
 0x3ff   :  { %3464 = vmatprep.subr.bf16.mxu0 %v3921_v0 }
 0x467   :  { %v919_v46 = vpop.permute.xlu0 %918 }
 0x468   :  { %922 = vst.msk [vmem:[#allocation2] sm:$0x3] %vm921_vm5, %v919_v46 }
 0x4c4   :  { %v1255_v47 = vpop.f32.mrb[8].mxu1 }
 0x4c5   :  { %v1260_v48 = vrot.slane %v1255_v47, 4  ;;  %v1261_v49 = vrot.slane %v1255_v47, 5  ;;  %v3246_v50 = vpop.f32.mrb[9].mxu1 }
 0x4c7   :  { %v1264_v52 = vadd.f32 %v1260_v48, %v4129_v28  ;;  %v1265_v53 = vadd.f32 %v1261_v49, %v4131_v30 }
 0x4c9   :  { %3765 = vtanh.f32 %v1264_v52 }
 0x4ca   :  { %3767 = vtanh.f32 %v1265_v53 }
 0x4cc   :  { %v1166_v54 = vpop.f32.mrb[6].mxu0 }
 0x4cd   :  { %v3707_v55 = vadd.f32 %v4181_v51, %v1166_v54  ;;  %v3235_v56 = vpop.f32.mrb[7].mxu0 }
 0x4cf   :  { %3769 = vtanh.f32 %v3707_v55 }
 0x4d3   :  { %v3766_v57 = vpop.eup %3765 }
 0x4d4   :  { %v3768_v58 = vpop.eup %3767  ;;  %v1281_v59 = vrot.slane %v3766_v57, 4 }
 0x4d5   :  { %v1282_v60 = vrot.slane %v3768_v58, 3 }
 0x4d7   :  { %v1283_v61 = vsel %vm245_vm2, %v1282_v60, %v1281_v59  ;;  %v2225_v59 = vld [vmem:[#allocation8 + $0x28] sm:$0xff]  ;;  %v2223_v60 = vld [vmem:[#allocation8 + $0x18] sm:$0xff] }
 0x4d8   :  { %3256 = vmatmul.mubr.msk.f32.vlgmr.msra.gmra.mrb[10].mxu1 %vm149_vm1, %v1283_v61  ;;  %3278 = vmatmul.mubr.msk.f32.vlgmr.msra.gmra.mrb[8].mxu0 %vm149_vm1, %v1283_v61 }
 0x4d9   :  { %v3770_v62 = vpop.eup %3769  ;;  %3454 = vmatpush3.bf16.msra.mxu1 %v4141_v39  ;;  %3266 = vmatprep.mubr.msk.f32.mxu1 %vm3922_vm0, %v3923_v1 }
 0x4da   :  { %3455 = vmatprep.subr.bf16.mxu1 %v3921_v0  ;;  %v1179_v63 = vrot.slane %v3770_v62, %v4211_v20  ;;  %3466 = vmatpush3.bf16.msra.mxu0 %v4115_v18 }
 0x4db   :  { %3467 = vmatprep.subr.bf16.mxu0 %v3921_v0  ;;  %3288 = vmatprep.mubr.msk.f32.mxu0 %vm3922_vm0, %v3923_v1 }
 0x4dc   :  { %1180 = vrot.lane.b32.xlu0 %v1179_v63, %s3926_s20  ;;  %v2220_v63 = vld [vmem:[#allocation8] sm:$0xff] }
 0x4dd   :  { %3457 = vmatpush3.bf16.msra.mxu1 %v4153_v44 }
 0x4de   :  { %3476 = vmatprep.subr.bf16.mxu1 %v3921_v0  ;;  %3469 = vmatpush3.bf16.msra.mxu0 %v4119_v21 }
 0x4df   :  { %3470 = vmatprep.subr.bf16.mxu0 %v3921_v0 }
 0x4e0   :  { %3267 = vmatmul.mubr.msk.f32.vlgmr.msra.gmra.mrb[10].mxu1 %vm149_vm1, %v3770_v62  ;;  %v2227_v62 = vld [vmem:[#allocation8 + $0x38] sm:$0xff] }
 0x4e1   :  { %3478 = vmatpush3.bf16.msra.mxu1 %v4092_v9  ;;  %3310 = vmatprep.mubr.msk.f32.mxu1 %vm3922_vm0, %v3923_v1 }
 0x4e2   :  { %3479 = vmatprep.subr.bf16.mxu1 %v3921_v0 }
 0x4e5   :  { %3481 = vmatpush3.bf16.msra.mxu1 %v4099_v13 }
 0x4e6   :  { %3482 = vmatprep.subr.bf16.mxu1 %v3921_v0 }
 0x54e   :  { %v1181_v2 = vpop.permute.xlu0 %1180 }
 0x54f   :  { %1184 = vst.msk [vmem:[#allocation2] sm:$0x3] %vm1183_vm6, %v1181_v2  ;;  %v3576_v2 = vpack.c.bf16 %v2227_v62, %v2223_v60  ;;  %v2263_v60 = vld [vmem:[#allocation8 + $0x158] sm:$0xff] }
 0x5ab   :  { %v1505_v5 = vpop.f32.mrb[8].mxu0 }
 0x5ac   :  { %v1510_v6 = vrot.slane %v1505_v5, 3  ;;  %v1511_v7 = vrot.slane %v1505_v5, 4  ;;  %v3279_v10 = vpop.f32.mrb[9].mxu0 }
 0x5ad   :  { %v2233_v10 = vld [vmem:[#allocation8 + $0x68] sm:$0xff] }
 0x5ae   :  { %v1514_v11 = vadd.f32 %v1510_v6, %v4129_v28  ;;  %v1515_v12 = vadd.f32 %v1511_v7, %v4131_v30  ;;  %v2226_v6 = vld [vmem:[#allocation8 + $0x30] sm:$0xff] }
 0x5b0   :  { %3771 = vtanh.f32 %v1514_v11  ;;  %v2231_v11 = vld [vmem:[#allocation8 + $0x58] sm:$0xff] }
 0x5b1   :  { %3773 = vtanh.f32 %v1515_v12  ;;  %v2235_v12 = vld [vmem:[#allocation8 + $0x78] sm:$0xff] }
 0x5b3   :  { %v1428_v14 = vpop.f32.mrb[10].mxu1 }
 0x5b4   :  { %v3708_v15 = vadd.f32 %v4181_v51, %v1428_v14  ;;  %v3268_v16 = vpop.f32.mrb[11].mxu1  ;;  %v3580_v14 = vpack.c.bf16 %v2235_v12, %v2231_v11  ;;  %v2271_v11 = vld [vmem:[#allocation8 + $0x198] sm:$0xff] }
 0x5b5   :  { %v2232_v16 = vld [vmem:[#allocation8 + $0x60] sm:$0xff]  ;;  %v2275_v12 = vld [vmem:[#allocation8 + $0x1b8] sm:$0xff] }
 0x5b6   :  { %3775 = vtanh.f32 %v3708_v15  ;;  %v2228_v15 = vld [vmem:[#allocation8 + $0x40] sm:$0xff] }
 0x5ba   :  { %v3772_v17 = vpop.eup %3771 }
 0x5bb   :  { %v3774_v19 = vpop.eup %3773  ;;  %v1531_v22 = vrot.slane %v3772_v17, 5  ;;  %v2230_v17 = vld [vmem:[#allocation8 + $0x50] sm:$0xff] }
 0x5bc   :  { %v1532_v23 = vrot.slane %v3774_v19, 4  ;;  %v3518_v19 = vpack.c.bf16 %v2232_v16, %v2228_v15  ;;  %v2268_v16 = vld [vmem:[#allocation8 + $0x180] sm:$0xff] }
 0x5be   :  { %v1533_v24 = vsel %vm245_vm2, %v1532_v23, %v1531_v22  ;;  %v2234_v22 = vld [vmem:[#allocation8 + $0x70] sm:$0xff]  ;;  %v2237_v23 = vld [vmem:[#allocation8 + $0x88] sm:$0xff] }
 0x5bf   :  { %3289 = vmatmul.mubr.msk.f32.vlgmr.msra.gmra.mrb[10].mxu0 %vm149_vm1, %v1533_v24  ;;  %3311 = vmatmul.mubr.msk.f32.vlgmr.msra.gmra.mrb[12].mxu1 %vm149_vm1, %v1533_v24  ;;  %v2241_v24 = vld [vmem:[#allocation8 + $0xa8] sm:$0xff] }
 0x5c0   :  { %v3776_v25 = vpop.eup %3775  ;;  %3472 = vmatpush3.bf16.msra.mxu0 %v4141_v39  ;;  %3299 = vmatprep.mubr.msk.f32.mxu0 %vm3922_vm0, %v3923_v1 }
 0x5c1   :  { %1434 = vst.msk [vmem:[#allocation2 + $0x2] sm:$0x3] %vm398_vm3, %v3776_v25  ;;  %3473 = vmatprep.subr.bf16.mxu0 %v3921_v0  ;;  %3484 = vmatpush3.bf16.msra.mxu1 %v4115_v18 }
 0x5c2   :  { %3485 = vmatprep.subr.bf16.mxu1 %v3921_v0  ;;  %3321 = vmatprep.mubr.msk.f32.mxu1 %vm3922_vm0, %v3923_v1 }
 0x5c4   :  { %3475 = vmatpush3.bf16.msra.mxu0 %v4153_v44 }
 0x5c5   :  { %3494 = vmatprep.subr.bf16.mxu0 %v3921_v0  ;;  %3487 = vmatpush3.bf16.msra.mxu1 %v4119_v21 }
 0x5c6   :  { %3488 = vmatprep.subr.bf16.mxu1 %v3921_v0 }
 0x5c7   :  { %3300 = vmatmul.mubr.msk.f32.vlgmr.msra.gmra.mrb[10].mxu0 %vm149_vm1, %v3776_v25  ;;  %v3582_v25 = vpack.c.bf16 %v2234_v22, %v2230_v17  ;;  %v2272_v17 = vld [vmem:[#allocation8 + $0x1a0] sm:$0xff]  ;;  %v3600_v22 = vpack.c.bf16 %v2275_v12, %v2271_v11  ;;  %v2313_v11 = vld [vmem:[#allocation8 + $0x2e8] sm:$0xff]  ;;  %v2311_v12 = vld [vmem:[#allocation8 + $0x2d8] sm:$0xff] }
 0x5c8   :  { %3496 = vmatpush3.bf16.msra.mxu0 %v4092_v9  ;;  %3343 = vmatprep.mubr.msk.f32.mxu0 %vm3922_vm0, %v3923_v1 }
 0x5c9   :  { %3497 = vmatprep.subr.bf16.mxu0 %v3921_v0 }
 0x5cc   :  { %3499 = vmatpush3.bf16.msra.mxu0 %v4099_v13 }
 0x5cd   :  { %3500 = vmatprep.subr.bf16.mxu0 %v3921_v0 }
 0x692   :  { %v1767_v26 = vpop.f32.mrb[12].mxu1 }
 0x693   :  { %v1772_v27 = vrot.slane %v1767_v26, 2  ;;  %v1773_v29 = vrot.slane %v1767_v26, 3  ;;  %v3312_v31 = vpop.f32.mrb[13].mxu1  ;;  %v3520_v26 = vpack.c.bf16 %v2241_v24, %v2237_v23  ;;  %v2274_v23 = vld [vmem:[#allocation8 + $0x1b0] sm:$0xff]  ;;  %v2277_v24 = vld [vmem:[#allocation8 + $0x1c8] sm:$0xff] }
 0x694   :  { %v2236_v31 = vld [vmem:[#allocation8 + $0x80] sm:$0xff] }
 0x695   :  { %v1776_v32 = vadd.f32 %v1772_v27, %v4129_v28  ;;  %v1777_v33 = vadd.f32 %v1773_v29, %v4131_v30  ;;  %v2239_v27 = vld [vmem:[#allocation8 + $0x98] sm:$0xff] }
 0x696   :  { %v2243_v29 = vld [vmem:[#allocation8 + $0xb8] sm:$0xff] }
 0x697   :  { %3777 = vtanh.f32 %v1776_v32  ;;  %v3584_v32 = vpack.c.bf16 %v2243_v29, %v2239_v27  ;;  %v2283_v27 = vld [vmem:[#allocation8 + $0x1f8] sm:$0xff]  ;;  %v3538_v29 = vpack.c.bf16 %v2272_v17, %v2268_v16  ;;  %v2308_v17 = vld [vmem:[#allocation8 + $0x2c0] sm:$0xff] }
 0x698   :  { %3779 = vtanh.f32 %v1777_v33  ;;  %v2240_v33 = vld [vmem:[#allocation8 + $0xa0] sm:$0xff] }
 0x69a   :  { %v1679_v9 = vpop.f32.mrb[10].mxu0 }
 0x69b   :  { %v3709_v34 = vadd.f32 %v4181_v51, %v1679_v9  ;;  %v3301_v35 = vpop.f32.mrb[11].mxu0  ;;  %v2238_v9 = vld [vmem:[#allocation8 + $0x90] sm:$0xff] }
 0x69c   :  { %v3522_v35 = vpack.c.bf16 %v2240_v33, %v2236_v31  ;;  %v2276_v33 = vld [vmem:[#allocation8 + $0x1c0] sm:$0xff] }
 0x69d   :  { %3781 = vtanh.f32 %v3709_v34  ;;  %v2242_v34 = vld [vmem:[#allocation8 + $0xb0] sm:$0xff] }
 0x6a1   :  { %v3778_v36 = vpop.eup %3777 }
 0x6a2   :  { %v3780_v37 = vpop.eup %3779  ;;  %v1793_v13 = vrot.slane %v3778_v36, 6  ;;  %v2245_v36 = vld [vmem:[#allocation8 + $0xc8] sm:$0xff] }
 0x6a3   :  { %v1794_v38 = vrot.slane %v3780_v37, 5  ;;  %v2249_v37 = vld [vmem:[#allocation8 + $0xe8] sm:$0xff] }
 0x6a5   :  { %v1795_v40 = vsel %vm245_vm2, %v1794_v38, %v1793_v13  ;;  %v2247_v13 = vld [vmem:[#allocation8 + $0xd8] sm:$0xff]  ;;  %v3586_v38 = vpack.c.bf16 %v2242_v34, %v2238_v9  ;;  %v2280_v9 = vld [vmem:[#allocation8 + $0x1e0] sm:$0xff]  ;;  %v2278_v34 = vld [vmem:[#allocation8 + $0x1d0] sm:$0xff] }
 0x6a6   :  { %3322 = vmatmul.mubr.msk.f32.vlgmr.msra.gmra.mrb[14].mxu1 %vm149_vm1, %v1795_v40  ;;  %3344 = vmatmul.mubr.msk.f32.vlgmr.msra.gmra.mrb[12].mxu0 %vm149_vm1, %v1795_v40  ;;  %v3524_v40 = vpack.c.bf16 %v2249_v37, %v2245_v36  ;;  %v2282_v36 = vld [vmem:[#allocation8 + $0x1f0] sm:$0xff]  ;;  %v2285_v37 = vld [vmem:[#allocation8 + $0x208] sm:$0xff] }
 0x6a7   :  { %v3782_v41 = vpop.eup %3781  ;;  %3490 = vmatpush3.bf16.msra.mxu1 %v4141_v39  ;;  %3332 = vmatprep.mubr.msk.f32.mxu1 %vm3922_vm0, %v3923_v1 }
 0x6a8   :  { %3491 = vmatprep.subr.bf16.mxu1 %v3921_v0  ;;  %v1692_v42 = vrot.slane %v3782_v41, %v4211_v20  ;;  %3502 = vmatpush3.bf16.msra.mxu0 %v4115_v18 }
 0x6a9   :  { %3503 = vmatprep.subr.bf16.mxu0 %v3921_v0  ;;  %3354 = vmatprep.mubr.msk.f32.mxu0 %vm3922_vm0, %v3923_v1 }
 0x6aa   :  { %1693 = vrot.lane.b32.xlu1 %v1692_v42, %s3919_s24  ;;  %v2244_v42 = vld [vmem:[#allocation8 + $0xc0] sm:$0xff] }
 0x6ab   :  { %3493 = vmatpush3.bf16.msra.mxu1 %v4153_v44 }
 0x6ac   :  { %3505 = vmatpush3.bf16.msra.mxu0 %v4119_v21 }
 0x6ad   :  { %3506 = vmatprep.subr.bf16.mxu0 %v3921_v0 }
 0x6ae   :  { %3333 = vmatmul.mubr.msk.f32.vlgmr.msra.gmra.mrb[14].mxu1 %vm149_vm1, %v3782_v41  ;;  %v2251_v41 = vld [vmem:[#allocation8 + $0xf8] sm:$0xff] }
 0x71c   :  { %v1694_v43 = vpop.permute.xlu1 %1693 }
 0x71d   :  { %1696 = vst.msk [vmem:[#allocation2 + $0x2] sm:$0x3] %vm659_vm4, %v1694_v43  ;;  %v2248_v43 = vld [vmem:[#allocation8 + $0xe0] sm:$0xff] }
 0x779   :  { %v2028_v45 = vpop.f32.mrb[12].mxu0 }
 0x77a   :  { %v2033_v18 = vrot.slane %v2028_v45, 1  ;;  %v2034_v46 = vrot.slane %v2028_v45, 2  ;;  %v3345_v47 = vpop.f32.mrb[13].mxu0  ;;  %v3588_v45 = vpack.c.bf16 %v2251_v41, %v2247_v13  ;;  %v2289_v13 = vld [vmem:[#allocation8 + $0x228] sm:$0xff]  ;;  %v3542_v41 = vpack.c.bf16 %v2280_v9, %v2276_v33  ;;  %v2316_v9 = vld [vmem:[#allocation8 + $0x300] sm:$0xff] }
 0x77b   :  { %v2253_v47 = vld [vmem:[#allocation8 + $0x108] sm:$0xff] }
 0x77c   :  { %v2037_v48 = vadd.f32 %v2033_v18, %v4129_v28  ;;  %v2038_v49 = vadd.f32 %v2034_v46, %v4131_v30  ;;  %v2221_v30 = vld [vmem:[#allocation8 + $0x8] sm:$0xff]  ;;  %v2246_v18 = vld [vmem:[#allocation8 + $0xd0] sm:$0xff] }
 0x77d   :  { %v3512_v61 = vpack.c.bf16 %v2225_v59, %v2221_v30  ;;  %v2250_v46 = vld [vmem:[#allocation8 + $0xf0] sm:$0xff]  ;;  %v2261_v30 = vld [vmem:[#allocation8 + $0x148] sm:$0xff] }
 0x77e   :  { %3783 = vtanh.f32 %v2037_v48  ;;  %v2265_v59 = vld [vmem:[#allocation8 + $0x168] sm:$0xff] }
 0x77f   :  { %3785 = vtanh.f32 %v2038_v49  ;;  %3513 = vmatprep.subr.bf16.mxu1 %v3512_v61  ;;  %v2257_v49 = vld [vmem:[#allocation8 + $0x128] sm:$0xff]  ;;  %v2267_v61 = vld [vmem:[#allocation8 + $0x178] sm:$0xff] }
 0x781   :  { %v1940_v50 = vpop.f32.mrb[14].mxu1 }
 0x782   :  { %v3710_v21 = vadd.f32 %v4181_v51, %v1940_v50  ;;  %v3334_v52 = vpop.f32.mrb[15].mxu1  ;;  %v2255_v50 = vld [vmem:[#allocation8 + $0x118] sm:$0xff] }
 0x783   :  { %v3526_v52 = vpack.c.bf16 %v2248_v43, %v2244_v42  ;;  %v3606_v42 = vpack.c.bf16 %v2282_v36, %v2278_v34  ;;  %v3544_v43 = vpack.c.bf16 %v2289_v13, %v2285_v37  ;;  %v2320_v34 = vld [vmem:[#allocation8 + $0x320] sm:$0xff]  ;;  %v2322_v37 = vld [vmem:[#allocation8 + $0x330] sm:$0xff]  ;;  %v2325_v13 = vld [vmem:[#allocation8 + $0x348] sm:$0xff] }
 0x784   :  { %3787 = vtanh.f32 %v3710_v21  ;;  %v2259_v21 = vld [vmem:[#allocation8 + $0x138] sm:$0xff] }
 0x788   :  { %v3784_v53 = vpop.eup %3783 }
 0x789   :  { %v3786_v54 = vpop.eup %3785  ;;  %v2054_v55 = vrot.slane %v3784_v53, 7  ;;  %v3590_v53 = vpack.c.bf16 %v2250_v46, %v2246_v18  ;;  %v2288_v18 = vld [vmem:[#allocation8 + $0x220] sm:$0xff]  ;;  %v2286_v46 = vld [vmem:[#allocation8 + $0x210] sm:$0xff] }
 0x78a   :  { %v2055_v56 = vrot.slane %v3786_v54, 6  ;;  %v3528_v54 = vpack.c.bf16 %v2257_v49, %v2253_v47  ;;  %v2293_v49 = vld [vmem:[#allocation8 + $0x248] sm:$0xff] }
 0x78c   :  { %v2056_v57 = vsel %vm245_vm2, %v2055_v56, %v2054_v55  ;;  %v2252_v55 = vld [vmem:[#allocation8 + $0x100] sm:$0xff] }
 0x78d   :  { %3355 = vmatmul.mubr.msk.f32.vlgmr.msra.gmra.mrb[14].mxu0 %vm149_vm1, %v2056_v57  ;;  %v2256_v56 = vld [vmem:[#allocation8 + $0x120] sm:$0xff]  ;;  %v2254_v57 = vld [vmem:[#allocation8 + $0x110] sm:$0xff] }
 0x78e   :  { %v3788_v58 = vpop.eup %3787  ;;  %3508 = vmatpush3.bf16.msra.mxu0 %v4141_v39  ;;  %3365 = vmatprep.mubr.msk.f32.mxu0 %vm3922_vm0, %v3923_v1  ;;  %v2224_v39 = vld [vmem:[#allocation8 + $0x20] sm:$0xff]  ;;  %v2222_v1 = vld [vmem:[#allocation8 + $0x10] sm:$0xff]  ;;  %v3530_v62 = vpack.c.bf16 %v2256_v56, %v2252_v55 }
 0x78f   :  { %3509 = vmatprep.subr.bf16.mxu0 %v3921_v0  ;;  %v1953_v28 = vrot.slane %v3788_v58, %v4211_v20  ;;  %v3514_v5 = vpack.c.bf16 %v2224_v39, %v2220_v63  ;;  %v2229_v0 = vld [vmem:[#allocation8 + $0x48] sm:$0xff]  ;;  %v3578_v7 = vpack.c.bf16 %v2226_v6, %v2222_v1  ;;  %v3532_v39 = vpack.c.bf16 %v2265_v59, %v2261_v30  ;;  %v2262_v1 = vld [vmem:[#allocation8 + $0x150] sm:$0xff]  ;;  %v2292_v56 = vld [vmem:[#allocation8 + $0x240] sm:$0xff] }
 0x790   :  { %v3596_v6 = vpack.c.bf16 %v2267_v61, %v2263_v60  ;;  %v2298_v30 = vld [vmem:[#allocation8 + $0x270] sm:$0xff]  ;;  %v2301_v59 = vld [vmem:[#allocation8 + $0x288] sm:$0xff]  ;;  %v2303_v61 = vld [vmem:[#allocation8 + $0x298] sm:$0xff] }
 0x791   :  { %1954 = vrot.lane.b32.xlu1 %v1953_v28, %s3925_s7  ;;  %3515 = vmatpush1.bf16.msra.mxu1 %v3514_v5  ;;  %v2258_v28 = vld [vmem:[#allocation8 + $0x130] sm:$0xff]  ;;  %v2264_v5 = vld [vmem:[#allocation8 + $0x160] sm:$0xff]  ;;  %v2305_v60 = vld [vmem:[#allocation8 + $0x2a8] sm:$0xff] }
 0x792   :  { %3511 = vmatpush3.bf16.msra.mxu0 %v4153_v44  ;;  %v3516_v44 = vpack.c.bf16 %v2233_v10, %v2229_v0  ;;  %v3594_v63 = vpack.c.bf16 %v2258_v28, %v2254_v57  ;;  %v2266_v0 = vld [vmem:[#allocation8 + $0x170] sm:$0xff]  ;;  %v2273_v10 = vld [vmem:[#allocation8 + $0x1a8] sm:$0xff]  ;;  %v2296_v57 = vld [vmem:[#allocation8 + $0x260] sm:$0xff] }
 0x793   :  { %3577 = vmatprep.subr.bf16.mxu0 %v3576_v2  ;;  %v2260_v2 = vld [vmem:[#allocation8 + $0x140] sm:$0xff] }
 0x794   :  { %3517 = vmatprep.subr.bf16.mxu1 %v3516_v44  ;;  %v3534_v44 = vpack.c.bf16 %v2264_v5, %v2260_v2  ;;  %v3552_v2 = vpack.c.bf16 %v2305_v60, %v2301_v59  ;;  %v2300_v5 = vld [vmem:[#allocation8 + $0x280] sm:$0xff] }
 0x795   :  { %3366 = vmatmul.mubr.msk.f32.vlgmr.msra.gmra.mrb[14].mxu0 %vm149_vm1, %v3788_v58  ;;  %3519 = vmatpush1.bf16.msra.mxu1 %v3518_v19  ;;  %v3592_v58 = vpack.c.bf16 %v2259_v21, %v2255_v50  ;;  %v2270_v19 = vld [vmem:[#allocation8 + $0x190] sm:$0xff]  ;;  %v2297_v50 = vld [vmem:[#allocation8 + $0x268] sm:$0xff]  ;;  %v2295_v21 = vld [vmem:[#allocation8 + $0x258] sm:$0xff] }
 0x796   :  { %3579 = vmatpush1.bf16.msra.mxu0 %v3578_v7  ;;  %3521 = vmatprep.subr.bf16.mxu1 %v3520_v26  ;;  %v2269_v7 = vld [vmem:[#allocation8 + $0x188] sm:$0xff]  ;;  %v2279_v26 = vld [vmem:[#allocation8 + $0x1d8] sm:$0xff]  ;;  %v3602_v31 = vpack.c.bf16 %v2274_v23, %v2270_v19  ;;  %v3548_v55 = vpack.c.bf16 %v2297_v50, %v2293_v49  ;;  %v2312_v19 = vld [vmem:[#allocation8 + $0x2e0] sm:$0xff] }
 0x797   :  { %3581 = vmatprep.subr.bf16.mxu0 %v3580_v14  ;;  %v3598_v14 = vpack.c.bf16 %v2266_v0, %v2262_v1  ;;  %v3536_v15 = vpack.c.bf16 %v2273_v10, %v2269_v7  ;;  %v2304_v1 = vld [vmem:[#allocation8 + $0x2a0] sm:$0xff]  ;;  %v2306_v7 = vld [vmem:[#allocation8 + $0x2b0] sm:$0xff]  ;;  %v2309_v10 = vld [vmem:[#allocation8 + $0x2c8] sm:$0xff] }
 0x798   :  { %v3556_v16 = vpack.c.bf16 %v2313_v11, %v2309_v10  ;;  %v2326_v49 = vld [vmem:[#allocation8 + $0x350] sm:$0xff]  ;;  %v2336_v59 = vld [vmem:[#allocation8 + $0x3a0] sm:$0xff] }
 0x799   :  { %3523 = vmatpush1.bf16.msra.mxu1 %v3522_v35  ;;  %v3604_v35 = vpack.c.bf16 %v2283_v27, %v2279_v26  ;;  %v2321_v26 = vld [vmem:[#allocation8 + $0x328] sm:$0xff]  ;;  %v2319_v27 = vld [vmem:[#allocation8 + $0x318] sm:$0xff]  ;;  %v2344_v10 = vld [vmem:[#allocation8 + $0x3e0] sm:$0xff] }
 0x79a   :  { %3583 = vmatpush1.bf16.msra.mxu0 %v3582_v25  ;;  %3525 = vmatprep.subr.bf16.mxu1 %v3524_v40  ;;  %v2281_v25 = vld [vmem:[#allocation8 + $0x1e8] sm:$0xff]  ;;  %v2291_v40 = vld [vmem:[#allocation8 + $0x238] sm:$0xff]  ;;  %v2342_v11 = vld [vmem:[#allocation8 + $0x3d0] sm:$0xff] }
 0x79b   :  { %3585 = vmatprep.subr.bf16.mxu0 %v3584_v32  ;;  %v3540_v32 = vpack.c.bf16 %v2281_v25, %v2277_v24  ;;  %v2314_v24 = vld [vmem:[#allocation8 + $0x2f0] sm:$0xff]  ;;  %v2317_v25 = vld [vmem:[#allocation8 + $0x308] sm:$0xff] }
 0x79c   :  { %v3560_v33 = vpack.c.bf16 %v2321_v26, %v2317_v25 }
 0x79d   :  { %3527 = vmatpush1.bf16.msra.mxu1 %v3526_v52  ;;  %v2299_v52 = vld [vmem:[#allocation8 + $0x278] sm:$0xff] }
 0x79e   :  { %3587 = vmatpush1.bf16.msra.mxu0 %v3586_v38  ;;  %3529 = vmatprep.subr.bf16.mxu1 %v3528_v54  ;;  %v2287_v38 = vld [vmem:[#allocation8 + $0x218] sm:$0xff]  ;;  %v3612_v28 = vpack.c.bf16 %v2299_v52, %v2295_v21 }
 0x79f   :  { %3589 = vmatprep.subr.bf16.mxu0 %v3588_v45  ;;  %v2284_v45 = vld [vmem:[#allocation8 + $0x200] sm:$0xff]  ;;  %v3608_v47 = vpack.c.bf16 %v2291_v40, %v2287_v38  ;;  %v2329_v38 = vld [vmem:[#allocation8 + $0x368] sm:$0xff]  ;;  %v2327_v40 = vld [vmem:[#allocation8 + $0x358] sm:$0xff] }
 0x7a1   :  { %3531 = vmatpush1.bf16.msra.mxu1 %v3530_v62  ;;  %v2307_v62 = vld [vmem:[#allocation8 + $0x2b8] sm:$0xff] }
 0x7a2   :  { %3591 = vmatpush1.bf16.msra.mxu0 %v3590_v53  ;;  %3533 = vmatprep.subr.bf16.mxu1 %v3532_v39  ;;  %v3546_v53 = vpack.c.bf16 %v2288_v18, %v2284_v45  ;;  %v3616_v0 = vpack.c.bf16 %v2307_v62, %v2303_v61  ;;  %v3564_v45 = vpack.c.bf16 %v2329_v38, %v2325_v13  ;;  %v2334_v62 = vld [vmem:[#allocation8 + $0x390] sm:$0xff] }
 0x7a3   :  { %3593 = vmatprep.subr.bf16.mxu0 %v3592_v58  ;;  %v2294_v58 = vld [vmem:[#allocation8 + $0x250] sm:$0xff] }
 0x7a4   :  { %v3614_v39 = vpack.c.bf16 %v2298_v30, %v2294_v58  ;;  %v2332_v30 = vld [vmem:[#allocation8 + $0x380] sm:$0xff] }
 0x7a5   :  { %3535 = vmatpush1.bf16.msra.mxu1 %v3534_v44  ;;  %v2315_v44 = vld [vmem:[#allocation8 + $0x2f8] sm:$0xff]  ;;  %v3570_v61 = vpack.c.bf16 %v2336_v59, %v2332_v30 }
 0x7a6   :  { %3595 = vmatpush1.bf16.msra.mxu0 %v3594_v63  ;;  %3537 = vmatprep.subr.bf16.mxu1 %v3536_v15  ;;  %v3550_v63 = vpack.c.bf16 %v2296_v57, %v2292_v56  ;;  %v3620_v23 = vpack.c.bf16 %v2315_v44, %v2311_v12  ;;  %v2337_v56 = vld [vmem:[#allocation8 + $0x3a8] sm:$0xff]  ;;  %v2335_v57 = vld [vmem:[#allocation8 + $0x398] sm:$0xff]  ;;  %v2346_v44 = vld [vmem:[#allocation8 + $0x3f0] sm:$0xff] }
 0x7a7   :  { %3597 = vmatprep.subr.bf16.mxu0 %v3596_v6  ;;  %v2302_v6 = vld [vmem:[#allocation8 + $0x290] sm:$0xff] }
 0x7a8   :  { %v3618_v15 = vpack.c.bf16 %v2306_v7, %v2302_v6  ;;  %v2340_v7 = vld [vmem:[#allocation8 + $0x3c0] sm:$0xff] }
 0x7a9   :  { %3539 = vmatpush1.bf16.msra.mxu1 %v3538_v29  ;;  %v2323_v29 = vld [vmem:[#allocation8 + $0x338] sm:$0xff]  ;;  %v3574_v12 = vpack.c.bf16 %v2344_v10, %v2340_v7 }
 0x7aa   :  { %3599 = vmatpush1.bf16.msra.mxu0 %v3598_v14  ;;  %3541 = vmatprep.subr.bf16.mxu1 %v3540_v32  ;;  %v3554_v14 = vpack.c.bf16 %v2304_v1, %v2300_v5  ;;  %v3624_v36 = vpack.c.bf16 %v2323_v29, %v2319_v27  ;;  %v2343_v5 = vld [vmem:[#allocation8 + $0x3d8] sm:$0xff] }
 0x7ab   :  { %3601 = vmatprep.subr.bf16.mxu0 %v3600_v22  ;;  %v2310_v22 = vld [vmem:[#allocation8 + $0x2d0] sm:$0xff]  ;;  %v2347_v1 = vld [vmem:[#allocation8 + $0x3f8] sm:$0xff] }
 0x7ac   :  { %v3622_v32 = vpack.c.bf16 %v2314_v24, %v2310_v22  ;;  %v4363_v24 = vsub.s32 2, %v4084_v3 }
 0x7ad   :  { %3543 = vmatpush1.bf16.msra.mxu1 %v3542_v41  ;;  %v2331_v41 = vld [vmem:[#allocation8 + $0x378] sm:$0xff] }
 0x7ae   :  { %3603 = vmatpush1.bf16.msra.mxu0 %v3602_v31  ;;  %3545 = vmatprep.subr.bf16.mxu1 %v3544_v43  ;;  %v3558_v31 = vpack.c.bf16 %v2312_v19, %v2308_v17  ;;  %v3628_v18 = vpack.c.bf16 %v2331_v41, %v2327_v40 }
 0x7af   :  { %3605 = vmatprep.subr.bf16.mxu0 %v3604_v35  ;;  %v2318_v35 = vld [vmem:[#allocation8 + $0x310] sm:$0xff] }
 0x7b0   :  { %v3626_v43 = vpack.c.bf16 %v2322_v37, %v2318_v35 }
 0x7b1   :  { %3547 = vmatpush1.bf16.msra.mxu1 %v3546_v53  ;;  %v2330_v53 = vld [vmem:[#allocation8 + $0x370] sm:$0xff] }
 0x7b2   :  { %3607 = vmatpush1.bf16.msra.mxu0 %v3606_v42  ;;  %3549 = vmatprep.subr.bf16.mxu1 %v3548_v55  ;;  %v3562_v42 = vpack.c.bf16 %v2320_v34, %v2316_v9  ;;  %v2333_v55 = vld [vmem:[#allocation8 + $0x388] sm:$0xff] }
 0x7b3   :  { %3609 = vmatprep.subr.bf16.mxu0 %v3608_v47  ;;  %v2324_v47 = vld [vmem:[#allocation8 + $0x340] sm:$0xff]  ;;  %v3568_v58 = vpack.c.bf16 %v2337_v56, %v2333_v55  ;;  %v2633_v55 = vld [vmem:[#allocation9 + $0x90] sm:$0xff] }
 0x7b5   :  { %3551 = vmatpush1.bf16.msra.mxu1 %v3550_v63  ;;  %v2338_v63 = vld [vmem:[#allocation8 + $0x3b0] sm:$0xff] }
 0x7b6   :  { %3553 = vmatprep.subr.bf16.mxu1 %v3552_v2  ;;  %v2345_v2 = vld [vmem:[#allocation8 + $0x3e8] sm:$0xff] }
 0x7b9   :  { %3555 = vmatpush1.bf16.msra.mxu1 %v3554_v14  ;;  %v3638_v14 = vpack.c.bf16 %v2346_v44, %v2342_v11 }
 0x7ba   :  { %3557 = vmatprep.subr.bf16.mxu1 %v3556_v16 }
 0x7bd   :  { %3559 = vmatpush1.bf16.msra.mxu1 %v3558_v31 }
 0x7be   :  { %3561 = vmatprep.subr.bf16.mxu1 %v3560_v33 }
 0x7c1   :  { %3563 = vmatpush1.bf16.msra.mxu1 %v3562_v42 }
 0x7c2   :  { %3565 = vmatprep.subr.bf16.mxu1 %v3564_v45  ;;  %v2631_v45 = vld [vmem:[#allocation9 + $0x80] sm:$0xff] }
 0x803   :  { %v1955_v48 = vpop.permute.xlu1 %1954 }
 0x804   :  { %1957 = vst.msk [vmem:[#allocation2 + $0x2] sm:$0x3] %vm921_vm5, %v1955_v48  ;;  %v2290_v48 = vld [vmem:[#allocation8 + $0x230] sm:$0xff] }
 0x805   :  { %v3610_v54 = vpack.c.bf16 %v2290_v48, %v2286_v46  ;;  %v2328_v48 = vld [vmem:[#allocation8 + $0x360] sm:$0xff] }
 0x806   :  { %v3566_v52 = vpack.c.bf16 %v2328_v48, %v2324_v47  ;;  %v2664_v48 = vld [vmem:[#allocation9 + $0x188] sm:$0xff] }
 0x807   :  { %3611 = vmatpush1.bf16.msra.mxu0 %v3610_v54  ;;  %v3630_v54 = vpack.c.bf16 %v2330_v53, %v2326_v49  ;;  %v2615_v49 = vld [vmem:[#allocation9] sm:$0xff] }
 0x808   :  { %3613 = vmatprep.subr.bf16.mxu0 %v3612_v28  ;;  %3567 = vmatpush1.bf16.msra.mxu1 %v3566_v52  ;;  %v2339_v28 = vld [vmem:[#allocation8 + $0x3b8] sm:$0xff]  ;;  %v2647_v53 = vld [vmem:[#allocation9 + $0x100] sm:$0xff] }
 0x809   :  { %v3632_v60 = vpack.c.bf16 %v2339_v28, %v2335_v57  ;;  %3569 = vmatprep.subr.bf16.mxu1 %v3568_v58  ;;  %v2634_v57 = vld [vmem:[#allocation9 + $0x98] sm:$0xff]  ;;  %v2665_v58 = vld [vmem:[#allocation9 + $0x190] sm:$0xff] }
 0x80a   :  { %v2666_v28 = vld [vmem:[#allocation9 + $0x198] sm:$0xff]  ;;  %v3644_v30 = vpack.c.bf16 %v2634_v57, %v2633_v55  ;;  %v2624_v55 = vld [vmem:[#allocation9 + $0x48] sm:$0xff] }
 0x80b   :  { %3615 = vmatpush1.bf16.msra.mxu0 %v3614_v39  ;;  %v2341_v39 = vld [vmem:[#allocation8 + $0x3c8] sm:$0xff]  ;;  %v3676_v59 = vpack.c.bf16 %v2666_v28, %v2665_v58  ;;  %v2655_v58 = vld [vmem:[#allocation9 + $0x140] sm:$0xff] }
 0x80c   :  { %3617 = vmatprep.subr.bf16.mxu0 %v3616_v0  ;;  %3571 = vmatpush1.bf16.msra.mxu1 %v3570_v61  ;;  %v3572_v6 = vpack.c.bf16 %v2345_v2, %v2341_v39  ;;  %v3636_v0 = vpack.c.bf16 %v2347_v1, %v2343_v5  ;;  %v2618_v61 = vld [vmem:[#allocation9 + $0x18] sm:$0xff]  ;;  %v2656_v28 = vld [vmem:[#allocation9 + $0x148] sm:$0xff] }
 0x80d   :  { %v2650_v39 = vld [vmem:[#allocation9 + $0x118] sm:$0xff] }
 0x80e   :  { %3573 = vmatprep.subr.bf16.mxu1 %v3572_v6 }
 0x80f   :  { %3619 = vmatpush1.bf16.msra.mxu0 %v3618_v15 }
 0x810   :  { %3621 = vmatprep.subr.bf16.mxu0 %v3620_v23  ;;  %3575 = vmatpush1.bf16.msra.mxu1 %v3574_v12  ;;  %v2348_v23 = vld [vmem:[%s4447_s9] sm:$0xf] }
 0x811   :  { %v2353_v25 = vrot.slane %v2348_v23, %v4090_v8  ;;  %v2361_v26 = vrot.slane %v2348_v23, %v4363_v24  ;;  %v2357_v27 = vrot.slane %v2348_v23, %v4087_v4 }
 0x813   :  { %3623 = vmatpush1.bf16.msra.mxu0 %v3622_v32 }
 0x814   :  { %3625 = vmatprep.subr.bf16.mxu0 %v3624_v36 }
 0x817   :  { %3627 = vmatpush1.bf16.msra.mxu0 %v3626_v43 }
 0x818   :  { %3629 = vmatprep.subr.bf16.mxu0 %v3628_v18  ;;  %v2632_v18 = vld [vmem:[#allocation9 + $0x88] sm:$0xff] }
 0x819   :  { %v3640_v47 = vpack.c.bf16 %v2632_v18, %v2631_v45 }
 0x81b   :  { %3631 = vmatpush1.bf16.msra.mxu0 %v3630_v54  ;;  %v2648_v54 = vld [vmem:[#allocation9 + $0x108] sm:$0xff]  ;;  %3641 = vmatprep.subr.bf16.mxu1 %v3640_v47  ;;  %v2654_v47 = vld [vmem:[#allocation9 + $0x138] sm:$0xff] }
 0x81c   :  { %3633 = vmatprep.subr.bf16.mxu0 %v3632_v60  ;;  %v3674_v56 = vpack.c.bf16 %v2648_v54, %v2647_v53  ;;  %v2617_v60 = vld [vmem:[#allocation9 + $0x10] sm:$0xff]  ;;  %v2672_v53 = vld [vmem:[#allocation9 + $0x1c8] sm:$0xff]  ;;  %v2623_v54 = vld [vmem:[#allocation9 + $0x40] sm:$0xff] }
 0x81d   :  { %v3658_v57 = vpack.c.bf16 %v2624_v55, %v2623_v54 }
 0x868   :  { %v2201_v46 = vpop.f32.mrb[14].mxu0 }
 0x869   :  { %v3711_v50 = vadd.f32 %v4181_v51, %v2201_v46  ;;  %v3367_v21 = vpop.f32.mrb[15].mxu0  ;;  %v3634_v51 = vpack.c.bf16 %v2338_v63, %v2334_v62  ;;  %v2663_v46 = vld [vmem:[#allocation9 + $0x180] sm:$0xff]  ;;  %v2649_v62 = vld [vmem:[#allocation9 + $0x110] sm:$0xff]  ;;  %v3646_v63 = vpack.c.bf16 %v2618_v61, %v2617_v60  ;;  %v2642_v60 = vld [vmem:[#allocation9 + $0xd8] sm:$0xff] }
 0x86a   :  { %v3672_v21 = vpack.c.bf16 %v2664_v48, %v2663_v46  ;;  %v2653_v46 = vld [vmem:[#allocation9 + $0x130] sm:$0xff] }
 0x86b   :  { %3789 = vtanh.f32 %v3711_v50  ;;  %3635 = vmatpush1.bf16.msra.mxu0 %v3634_v51  ;;  %v2616_v50 = vld [vmem:[#allocation9 + $0x8] sm:$0xff]  ;;  %v3678_v51 = vpack.c.bf16 %v2650_v39, %v2649_v62  ;;  %v3686_v48 = vpack.c.bf16 %v2654_v47, %v2653_v46  ;;  %v2673_v61 = vld [vmem:[#allocation9 + $0x1d0] sm:$0xff]  ;;  %v2674_v62 = vld [vmem:[#allocation9 + $0x1d8] sm:$0xff] }
 0x86c   :  { %3637 = vmatprep.subr.bf16.mxu0 %v3636_v0  ;;  %v3642_v52 = vpack.c.bf16 %v2616_v50, %v2615_v49  ;;  %v2639_v49 = vld [vmem:[#allocation9 + $0xc0] sm:$0xff]  ;;  %v2640_v50 = vld [vmem:[#allocation9 + $0xc8] sm:$0xff]  ;;  %v3692_v39 = vpack.c.bf16 %v2674_v62, %v2673_v61 }
 0x86f   :  { %3639 = vmatpush1.bf16.msra.mxu0 %v3638_v14 }
 0x870   :  { %3673 = vmatprep.subr.bf16.mxu0 %v3672_v21  ;;  %v2671_v21 = vld [vmem:[#allocation9 + $0x1c0] sm:$0xff] }
 0x875   :  { %v3790_v15 = vpop.eup %3789 }
 0x876   :  { %v2214_v16 = vrot.slane %v3790_v15, %v4211_v20  ;;  %v4366_v20 = vsub.s32 3, %v4084_v3 }
 0x878   :  { %2215 = vrot.lane.b32.xlu1 %v2214_v16, %s3926_s20  ;;  %v2365_v32 = vrot.slane %v2348_v23, %v4366_v20 }
 0x8ea   :  { %v2216_v17 = vpop.permute.xlu1 %2215 }
 0x8eb   :  { %2218 = vst.msk [vmem:[#allocation2 + $0x2] sm:$0x3] %vm1183_vm6, %v2216_v17 }
 0x8f2   :  { %v2910_v19 = vld.sshfl [vmem:[#allocation2] sm:$0x33 pattern:$0x76325410] }
 0x8f3   :  { %v2378_v22 = vcombine.high %v2910_v19, %v2910_v19 }
 0x8f5   :  { %2445 = vmatprep.mubr.f32.mxu1 %v2378_v22  ;;  %2516 = vmatprep.mubr.f32.mxu0 %v2378_v22 }
 0x8f6   :  { %2446 = vmatmul.mubr.f32.vlgmr.msra.gmra.mrb[16].mxu1 %v2910_v19  ;;  %2517 = vmatmul.mubr.f32.vlgmr.msra.gmra.mrb[16].mxu0 %v2910_v19 }
 0x8f7   :  { %3643 = vmatpush3.bf16.msra.mxu1 %v3642_v52  ;;  %3675 = vmatpush3.bf16.msra.mxu0 %v3674_v56  ;;  %v3656_v52 = vpack.c.bf16 %v2640_v50, %v2639_v49  ;;  %v3688_v56 = vpack.c.bf16 %v2672_v53, %v2671_v21 }
 0x8f8   :  { %3645 = vmatprep.subr.bf16.mxu1 %v3644_v30  ;;  %3677 = vmatprep.subr.bf16.mxu0 %v3676_v59  ;;  %v2641_v30 = vld [vmem:[#allocation9 + $0xd0] sm:$0xff]  ;;  %v3690_v59 = vpack.c.bf16 %v2656_v28, %v2655_v58 }
 0x8fb   :  { %3647 = vmatpush3.bf16.msra.mxu1 %v3646_v63  ;;  %3679 = vmatpush3.bf16.msra.mxu0 %v3678_v51  ;;  %v3660_v63 = vpack.c.bf16 %v2642_v60, %v2641_v30  ;;  %v2625_v51 = vld [vmem:[#allocation9 + $0x50] sm:$0xff] }
 0x9c9   :  { %v2447_v29 = vpop.f32.mrb[16].mxu1  ;;  %v2518_v31 = vpop.f32.mrb[16].mxu0 }
 0x9ca   :  { %v2448_v33 = vadd.f32 %v2447_v29, %v2353_v25  ;;  %v2449_v9 = vpop.f32.mrb[17].mxu1  ;;  %v2520_v34 = vpop.f32.mrb[17].mxu0  ;;  %v2519_v35 = vadd.f32 %v2518_v31, %v2361_v26  ;;  %v2635_v25 = vld [vmem:[#allocation9 + $0xa0] sm:$0xff]  ;;  %v2636_v26 = vld [vmem:[#allocation9 + $0xa8] sm:$0xff] }
 0x9cb   :  { %v2450_v36 = vadd.f32 %v2449_v9, %v2357_v27  ;;  %v2521_v13 = vadd.f32 %v2520_v34, %v2365_v32  ;;  %v2667_v27 = vld [vmem:[#allocation9 + $0x1a0] sm:$0xff]  ;;  %v3648_v29 = vpack.c.bf16 %v2636_v26, %v2635_v25  ;;  %v2668_v31 = vld [vmem:[#allocation9 + $0x1a8] sm:$0xff] }
 0x9cc   :  { %v2526_v37 = vsel %vm2525_vm7, %v2448_v33, 0.0  ;;  %v2529_v40 = vsel %vm2525_vm7, %v2519_v35, 0.0  ;;  %v2619_v32 = vld [vmem:[#allocation9 + $0x20] sm:$0xff]  ;;  %v3680_v9 = vpack.c.bf16 %v2668_v31, %v2667_v27  ;;  %v2660_v26 = vld [vmem:[#allocation9 + $0x168] sm:$0xff]  ;;  %v2645_v27 = vld [vmem:[#allocation9 + $0xf0] sm:$0xff] }
 0x9cd   :  { %v2527_v3 = vsel %vm2525_vm7, %v2450_v36, 0.0  ;;  %v2531_v42 = vsel %vm2525_vm7, %v2521_v13, 0.0  ;;  %3649 = vmatprep.subr.bf16.mxu1 %v3648_v29  ;;  %v2659_v25 = vld [vmem:[#allocation9 + $0x160] sm:$0xff]  ;;  %v2646_v29 = vld [vmem:[#allocation9 + $0xf8] sm:$0xff]  ;;  %v2677_v31 = vld [vmem:[#allocation9 + $0x1f0] sm:$0xff] }
 0x9ce   :  { %v2528_v38 = vadd.f32 %v2527_v3, %v2526_v37  ;;  %3681 = vmatprep.subr.bf16.mxu0 %v3680_v9  ;;  %v2637_v3 = vld [vmem:[#allocation9 + $0xb0] sm:$0xff]  ;;  %v3698_v9 = vpack.c.bf16 %v2660_v26, %v2659_v25  ;;  %v2912_v26 = vld [vmem:[%s4452_s14] ss:$0 sm:$0xff] }
 0x9d0   :  { %v2530_v41 = vadd.f32 %v2529_v40, %v2528_v38  ;;  %v2669_v38 = vld [vmem:[#allocation9 + $0x1b0] sm:$0xff] }
 0x9d2   :  { %v2532_v43 = vadd.f32 %v2531_v42, %v2530_v41  ;;  %v2670_v41 = vld [vmem:[#allocation9 + $0x1b8] sm:$0xff]  ;;  %v2621_v42 = vld [vmem:[#allocation9 + $0x30] sm:$0xff] }
 0x9d3   :  { %v3684_v45 = vpack.c.bf16 %v2670_v41, %v2669_v38 }
 0x9d4   :  { %2533 = vadd.xlane.f32.xlu0 %v2532_v43  ;;  %v2622_v43 = vld [vmem:[#allocation9 + $0x38] sm:$0xff] }
 0x9d5   :  { %v3654_v18 = vpack.c.bf16 %v2622_v43, %v2621_v42 }
 0xa61   :  { %v2534_v2 = vpop.xlane.xlu0 %2533 }
 0xa62   :  { %v2536_v5 = vmul.f32 0.001953125, %v2534_v2  ;;  %v2626_v2 = vld [vmem:[#allocation9 + $0x58] sm:$0xff] }
 0xa64   :  { %v4376_v1 = vsub.f32 %v2448_v33, %v2536_v5  ;;  %v4378_v6 = vsub.f32 %v2450_v36, %v2536_v5  ;;  %v4380_v0 = vsub.f32 %v2519_v35, %v2536_v5  ;;  %v4382_v7 = vsub.f32 %v2521_v13, %v2536_v5  ;;  %v2620_v33 = vld [vmem:[#allocation9 + $0x28] sm:$0xff]  ;;  %v2651_v35 = vld [vmem:[#allocation9 + $0x120] sm:$0xff]  ;;  %v2638_v13 = vld [vmem:[#allocation9 + $0xb8] sm:$0xff] }
 0xa65   :  { %v3650_v34 = vpack.c.bf16 %v2620_v33, %v2619_v32  ;;  %v2652_v36 = vld [vmem:[#allocation9 + $0x128] sm:$0xff]  ;;  %v3652_v40 = vpack.c.bf16 %v2638_v13, %v2637_v3  ;;  %v2657_v5 = vld [vmem:[#allocation9 + $0x150] sm:$0xff]  ;;  %v2678_v33 = vld [vmem:[#allocation9 + $0x1f8] sm:$0xff] }
 0xa66   :  { %v2541_v10 = vmul.f32 %v4376_v1, %v4376_v1  ;;  %v2542_v11 = vmul.f32 %v4378_v6, %v4378_v6  ;;  %v2543_v12 = vmul.f32 %v4380_v0, %v4380_v0  ;;  %v2544_v44 = vmul.f32 %v4382_v7, %v4382_v7  ;;  %v2661_v3 = vld [vmem:[#allocation9 + $0x170] sm:$0xff]  ;;  %v2662_v13 = vld [vmem:[#allocation9 + $0x178] sm:$0xff] }
 0xa67   :  { %v3682_v37 = vpack.c.bf16 %v2652_v36, %v2651_v35  ;;  %3651 = vmatpush3.bf16.msra.mxu1 %v3650_v34  ;;  %v3668_v34 = vpack.c.bf16 %v2646_v29, %v2645_v27  ;;  %v2629_v35 = vld [vmem:[#allocation9 + $0x70] sm:$0xff]  ;;  %v2630_v36 = vld [vmem:[#allocation9 + $0x78] sm:$0xff] }
 0xa68   :  { %v2545_v14 = vsel %vm2525_vm7, %v2541_v10, 0.0  ;;  %v2546_v15 = vsel %vm2525_vm7, %v2542_v11, 0.0  ;;  %v2548_v17 = vsel %vm2525_vm7, %v2543_v12, 0.0  ;;  %v2550_v22 = vsel %vm2525_vm7, %v2544_v44, 0.0  ;;  %3653 = vmatprep.subr.bf16.mxu1 %v3652_v40  ;;  %v2658_v11 = vld [vmem:[#allocation9 + $0x158] sm:$0xff]  ;;  %v2643_v12 = vld [vmem:[#allocation9 + $0xe0] sm:$0xff] }
 0xa69   :  { %v2547_v16 = vadd.f32 %v2546_v15, %v2545_v14  ;;  %3683 = vmatpush3.bf16.msra.mxu0 %v3682_v37  ;;  %v3662_v10 = vpack.c.bf16 %v2626_v2, %v2625_v51  ;;  %v2644_v44 = vld [vmem:[#allocation9 + $0xe8] sm:$0xff]  ;;  %v3694_v14 = vpack.c.bf16 %v2658_v11, %v2657_v5  ;;  %v3700_v37 = vpack.c.bf16 %v2678_v33, %v2677_v31  ;;  %v2913_v29 = vld [vmem:[%s4453_s15] ss:$0 sm:$0xff] }
 0xa6a   :  { %3685 = vmatprep.subr.bf16.mxu0 %v3684_v45  ;;  %v3664_v15 = vpack.c.bf16 %v2644_v44, %v2643_v12  ;;  %v3670_v38 = vpack.c.bf16 %v2630_v36, %v2629_v35  ;;  %v3702_v40 = vpack.c.bf16 %v2662_v13, %v2661_v3  ;;  %v2523_v45 = vld [vmem:[%s4448_s10] sm:$0xf] }
 0xa6b   :  { %v2549_v19 = vadd.f32 %v2548_v17, %v2547_v16  ;;  %3655 = vmatpush3.bf16.msra.mxu1 %v3654_v18  ;;  %v2675_v16 = vld [vmem:[#allocation9 + $0x1e0] sm:$0xff]  ;;  %v2676_v17 = vld [vmem:[#allocation9 + $0x1e8] sm:$0xff]  ;;  %v2524_v18 = vld [vmem:[%s4449_s11] sm:$0xf]  ;;  %v2573_v46 = vrot.slane %v2523_v45, %v4363_v24  ;;  %v2569_v47 = vrot.slane %v2523_v45, %v4087_v4  ;;  %v2565_v49 = vrot.slane %v2523_v45, %v4090_v8 }
 0xa6c   :  { %3657 = vmatprep.subr.bf16.mxu1 %v3656_v52  ;;  %v2594_v21 = vrot.slane %v2524_v18, %v4087_v4  ;;  %v2602_v52 = vrot.slane %v2524_v18, %v4366_v20  ;;  %v2590_v53 = vrot.slane %v2524_v18, %v4090_v8  ;;  %v2598_v54 = vrot.slane %v2524_v18, %v4363_v24 }
 0xa6d   :  { %v2551_v23 = vadd.f32 %v2550_v22, %v2549_v19  ;;  %3687 = vmatpush3.bf16.msra.mxu0 %v3686_v48  ;;  %v2627_v19 = vld [vmem:[#allocation9 + $0x60] sm:$0xff]  ;;  %v3696_v22 = vpack.c.bf16 %v2676_v17, %v2675_v16  ;;  %v2577_v48 = vrot.slane %v2523_v45, %v4366_v20 }
 0xa6e   :  { %3689 = vmatprep.subr.bf16.mxu0 %v3688_v56 }
 0xa6f   :  { %2552 = vadd.xlane.f32.xlu1 %v2551_v23  ;;  %3659 = vmatpush3.bf16.msra.mxu1 %v3658_v57  ;;  %v2628_v23 = vld [vmem:[#allocation9 + $0x68] sm:$0xff] }
 0xa70   :  { %3661 = vmatprep.subr.bf16.mxu1 %v3660_v63  ;;  %v3666_v32 = vpack.c.bf16 %v2628_v23, %v2627_v19 }
 0xa71   :  { %3691 = vmatpush3.bf16.msra.mxu0 %v3690_v59 }
 0xa72   :  { %3693 = vmatprep.subr.bf16.mxu0 %v3692_v39 }
 0xa73   :  { %3663 = vmatpush3.bf16.msra.mxu1 %v3662_v10 }
 0xa74   :  { %3665 = vmatprep.subr.bf16.mxu1 %v3664_v15 }
 0xa75   :  { %3695 = vmatpush3.bf16.msra.mxu0 %v3694_v14 }
 0xa76   :  { %3697 = vmatprep.subr.bf16.mxu0 %v3696_v22 }
 0xa77   :  { %3667 = vmatpush3.bf16.msra.mxu1 %v3666_v32 }
 0xa78   :  { %3669 = vmatprep.subr.bf16.mxu1 %v3668_v34 }
 0xa79   :  { %3699 = vmatpush3.bf16.msra.mxu0 %v3698_v9 }
 0xa7a   :  { %3701 = vmatprep.subr.bf16.mxu0 %v3700_v37 }
 0xa7b   :  { %3671 = vmatpush3.bf16.msra.mxu1 %v3670_v38 }
 0xa7d   :  { %3703 = vmatpush3.bf16.msra.mxu0 %v3702_v40 }
 0xafc   :  { %v2553_v41 = vpop.xlane.xlu1 %2552 }
 0xafd   :  { %v2554_v42 = vmul.f32 0.001953125, %v2553_v41 }
 0xaff   :  { %v2555_v43 = vadd.f32 1e-05, %v2554_v42 }
 0xb01   :  { %3791 = vrsqrt.f32 %v2555_v43 }
 0xb0b   :  { %v3792_v50 = vpop.eup %3791 }
 0xb0c   :  { %v2558_v55 = vmul.f32 %v3792_v50, %v4378_v6  ;;  %v2560_v56 = vmul.f32 %v3792_v50, %v4382_v7  ;;  %v2557_v57 = vmul.f32 %v3792_v50, %v4376_v1  ;;  %v2559_v58 = vmul.f32 %v3792_v50, %v4380_v0  ;;  %v2911_v0 = vld [vmem:[%s4451_s13] ss:$0 sm:$0xff] }
 0xb0e   :  { %v2583_v28 = vmul.f32 %v2569_v47, %v2558_v55  ;;  %v2585_v30 = vmul.f32 %v2577_v48, %v2560_v56  ;;  %v2582_v59 = vmul.f32 %v2565_v49, %v2557_v57  ;;  %v2584_v60 = vmul.f32 %v2573_v46, %v2559_v58 }
 0xb10   :  { %v2608_v61 = vadd.f32 %v2594_v21, %v2583_v28  ;;  %v2610_v4 = vadd.f32 %v2602_v52, %v2585_v30  ;;  %v2607_v62 = vadd.f32 %v2590_v53, %v2582_v59  ;;  %v2609_v20 = vadd.f32 %v2598_v54, %v2584_v60 }
 0xb12   :  { %v2612_v63 = vmax.f32 %v2608_v61, 0.0  ;;  %v2614_v8 = vmax.f32 %v2610_v4, 0.0  ;;  %v2611_v39 = vmax.f32 %v2607_v62, 0.0  ;;  %v2613_v24 = vmax.f32 %v2609_v20, 0.0 }
 0xb14   :  { %2750 = vmatprep.mubr.f32.mxu1 %v2612_v63  ;;  %2820 = vmatprep.mubr.f32.mxu0 %v2614_v8 }
 0xb15   :  { %2751 = vmatmul.mubr.f32.vlgmr.msra.gmra.mrb[18].mxu1 %v2611_v39  ;;  %2821 = vmatmul.mubr.f32.vlgmr.msra.gmra.mrb[18].mxu0 %v2613_v24 }
 0xbe8   :  { %v3066_v6 = vpop.f32.mrb[18].mxu1  ;;  %v3101_v1 = vpop.f32.mrb[18].mxu0 }
 0xbe9   :  { %v3067_v7 = vpop.f32.mrb[19].mxu1  ;;  %v3102_v51 = vpop.f32.mrb[19].mxu0 }
 0xbea   :  { %v3068_v2 = vadd.f32 %v3067_v7, %v3066_v6  ;;  %v3103_v5 = vadd.f32 %v3102_v51, %v3101_v1 }
 0xbec   :  { %v2753_v10 = vadd.f32 %v3068_v2, %v2911_v0 }
 0xbee   :  { %v2823_v11 = vadd.f32 %v3103_v5, %v2753_v10 }
 0xbf0   :  { %v2829_v12 = vsel %vm2828_vm8, %v2823_v11, 0.0 }
 0xbf1   :  { %2830 = vadd.xlane.f32.xlu0 %v2829_v12 }
 0xc7e   :  { %v2831_v44 = vpop.xlane.xlu0 %2830 }
 0xc7f   :  { %v2833_v14 = vmul.f32 0.25, %v2831_v44 }
 0xc81   :  { %v2834_v15 = vsub.f32 %v2823_v11, %v2833_v14 }
 0xc83   :  { %v2835_v16 = vmul.f32 %v2834_v15, %v2834_v15 }
 0xc85   :  { %v2836_v17 = vsel %vm2828_vm8, %v2835_v16, 0.0 }
 0xc86   :  { %2837 = vadd.xlane.f32.xlu0 %v2836_v17 }
 0xd13   :  { %v2838_v19 = vpop.xlane.xlu0 %2837 }
 0xd14   :  { %v2839_v22 = vmul.f32 0.25, %v2838_v19 }
 0xd16   :  { %v2840_v23 = vadd.f32 1e-05, %v2839_v22 }
 0xd18   :  { %3793 = vrsqrt.f32 %v2840_v23 }
 0xd22   :  { %v3794_v25 = vpop.eup %3793 }
 0xd23   :  { %v2842_v27 = vmul.f32 %v3794_v25, %v2834_v15 }
 0xd25   :  { %v2849_v31 = vmul.f32 %v2912_v26, %v2842_v27 }
 0xd27   :  { %v2856_v32 = vadd.f32 %v2913_v29, %v2849_v31 }
 0xd29   :  { %2857 = vst.msk [vmem:[#allocation11] sm:$0x3] %vm2828_vm8, %v2856_v32 }
 0xd2a   :  { %3894 = shalt.err (!%p3891_p8)
}
 0xd2b   :  { %s3895_s25 = scalar_lea.hbm %s4454_s16, 32 }
 0xd2c   :  { %p3896_p9 = scmp.ne.s32.totalorder %s4454_s16, %s3895_s25  ;;  %p3899_p10 = scmp.lt.u32.totalorder %s3895_s25, %s4454_s16 }
 0xd2e   :  { %p3901_p11 = pnand %p3899_p10, %p3896_p9 }
 0xd30   :  { %3904 = shalt.err (!%p3901_p11)
}
 0xd31   :  { %2867 = dma.vmem_to_hbm [thread:$0]  %s2865_s21, 32, %s4454_s16, [#allocation5]  }
 0xd32   :  { %3911 = dma.done.wait [#allocation5], 32  }
 0xd33   :  { %3912 = vsyncadd [#allocation5], 4294967264 }
 0xd34   :  { %2871 = vsyncpa [#allocation4], 1 }
 0xd35   :  { %2872 = vsyncpa [#allocation7], 1 }
 0xd36   :  { %2873 = vsyncpa [#allocation10], 1 }
 0xd37   :  { %2874 = vsyncpa [#allocation5], 1 }

</bundles_post_ra>
